<compile_context>
chip_gen: v6e
topology: v6e:2x2x1
jax: 0.10.0
libtpu: 0.0.40
codegen_flags: <defaults>
</compile_context>

<pallas_src>
import functools

import jax
import jax.numpy as jnp
from jax.experimental import pallas as pl
from jax.experimental.pallas import tpu as pltpu


# ---------------------------------------------------------------------------
# Single fused kernel: all attention heads + hm + residual/LN + ffn + final LN.
# Grid = (B,), everything for one batch element lives in VMEM.
# ---------------------------------------------------------------------------
def fused_block_kernel(
    x_ref, mask_ref, maskT_ref,
    w_ref, vv_ref, sb_ref, sel_ref, ve_ref,
    whm_ref, bhm_ref, lng_ref, lnb_ref,
    wf1_ref, bf1_ref, wf2_ref, bf2_ref, flng_ref, flnb_ref,
    out_ref,
    *, heads, fh):
    alpha = 0.2          # LeakyReLU slope inside the attention heads
    slope = 0.01         # torch default LeakyReLU slope (hm / ffn)
    NEG = -9e15
    eps = 1e-5

    def _leaky(v, a):
        return jnp.where(v > 0, v, a * v)

    def _layernorm(v, g, b):
        mu = jnp.mean(v, axis=-1, keepdims=True)
        var = jnp.mean((v - mu) * (v - mu), axis=-1, keepdims=True)
        return (v - mu) * jax.lax.rsqrt(var + eps) * g + b

    x = x_ref[0]                                   # (N, Din) f32 (kept for residual)
    mask = mask_ref[0]                             # (E, N) bf16 0/1 incidence
    maskT = maskT_ref[0]                           # (N, E) bf16 0/1 incidence^T
    sel = sel_ref[...]                             # (H, H*Fh) 0/1 head -> lane-block expander
    x_bf = x.astype(jnp.bfloat16)

    # Transferred node features for ALL heads at once (lane dim = H*Fh).
    xt = jnp.dot(x_bf, w_ref[...], preferred_element_type=jnp.float32)              # (N, H*Fh)

    # Folded attention-score projections for all heads (f32: these feed exp).
    xv = jnp.dot(x, vv_ref[...], preferred_element_type=jnp.float32) + sb_ref[...]  # (N, 2H)
    s1 = xv[:, :heads]                             # (N, H) stage-1 (edge-independent) score
    s_node = xv[:, heads:]                         # (N, H) stage-2 node part of the score

    # ---- stage 1: node -> edge, factored masked softmax, all heads in one matmul ----
    s1 = _leaky(s1, alpha)
    # per-head shift; softmax is shift-invariant (a per-edge masked max would need the (E,N)
    # score matrix this factored form is avoiding — fine unless scores have a huge range)
    p = jnp.exp(s1 - jnp.max(s1, axis=0, keepdims=True))                             # (N, H)
    p_big = jnp.dot(p, sel, preferred_element_type=jnp.float32)                      # (N, H*Fh)
    num = jnp.dot(mask, (p_big * xt).astype(jnp.bfloat16),
                  preferred_element_type=jnp.float32)                                # (E, H*Fh)
    den = jnp.dot(mask, p.astype(jnp.bfloat16),
                  preferred_element_type=jnp.float32)                                # (E, H)
    # epsilon guards hyperedges with no incident node (0/0); empty edges are masked in stage 2.
    inv_den = pl.reciprocal(den + 1e-20, approx=True)                                # (E, H)
    edge = num * jnp.dot(inv_den, sel, preferred_element_type=jnp.float32)           # (E, H*Fh)

    # stage-2 edge part of the score for all heads at once (block-diagonal ve): (E, H)
    s_edge = jnp.dot(edge, ve_ref[...], preferred_element_type=jnp.float32)

    # ---- stage 2 + hm projection, per head (static unrolled, HEADS is small), accumulated
    #      straight into the hm output so the per-head concat never materializes ----
    whm = whm_ref[...]                             # (H*Fh, Din) bf16
    n_rows, din = x.shape
    acc = jnp.zeros((n_rows, din), jnp.float32)
    for h in range(heads):
        s2 = s_node[:, h:h + 1] + jnp.transpose(s_edge[:, h:h + 1])                  # (N, E)
        s2 = _leaky(s2, alpha)
        att = jnp.where(maskT > 0, s2, NEG)
        att = jnp.exp(att - jnp.max(att, axis=-1, keepdims=True))
        att = att * pl.reciprocal(jnp.sum(att, axis=-1, keepdims=True), approx=True)  # (N, E)
        node = jnp.dot(att.astype(jnp.bfloat16),
                       edge[:, h * fh:(h + 1) * fh].astype(jnp.bfloat16),
                       preferred_element_type=jnp.float32)                            # (N, Fh)
        # concat=True -> ELU (clamp the discarded branch before exp)
        node = jnp.where(node > 0, node, jnp.exp(jnp.minimum(node, 0.0)) - 1.0)
        acc = acc + jnp.dot(node.astype(jnp.bfloat16), whm[h * fh:(h + 1) * fh, :],
                            preferred_element_type=jnp.float32)                       # (N, Din)

    # ---- hm bias + LeakyReLU + residual + LayerNorm (Dropout = identity at eval) ----
    lng = lng_ref[...]
    lnb = lnb_ref[...]
    y = _leaky(acc + bhm_ref[...], slope) + x
    y = _layernorm(y, lng, lnb)

    # ---- ffn (Linear+LeakyReLU)x2 + ffn LayerNorm + residual + final (shared) LayerNorm ----
    hdn = _leaky(jnp.dot(y.astype(jnp.bfloat16), wf1_ref[...],
                         preferred_element_type=jnp.float32) + bf1_ref[...], slope)
    hdn = _leaky(jnp.dot(hdn.astype(jnp.bfloat16), wf2_ref[...],
                         preferred_element_type=jnp.float32) + bf2_ref[...], slope)
    hdn = _layernorm(hdn, flng_ref[...], flnb_ref[...])
    y2 = hdn + y
    out_ref[0] = _layernorm(y2, lng, lnb).astype(out_ref.dtype)


# ---------------------------------------------------------------------------
# Forward pass: parameter folding in XLA (tiny), all activation work in one pallas_call.
# ---------------------------------------------------------------------------
def hyper_atten_block(x, Hm, p):
    B, N, Din = x.shape
    E = Hm.shape[1]
    heads = p["heads"]
    H = len(heads)
    Fh = heads[0]["W"].shape[1]
    HF = H * Fh
    f32, bf16 = jnp.float32, jnp.bfloat16

    # ---- fold & stack per-head parameters (parameter-side work only) ----
    # Score projections fold algebraically: x@W2 / edge@W3 are only ever reduced against
    # halves of the attention vectors a / a2.
    W_all = jnp.concatenate([h["W"] for h in heads], axis=1).astype(bf16)          # (Din, H*Fh)
    v1 = jnp.stack([h["W2"] @ h["a1"][1] for h in heads], axis=1)                  # (Din, H)
    vn = jnp.stack([h["W2"] @ h["a2"][0] for h in heads], axis=1)                  # (Din, H)
    vv = jnp.concatenate([v1, vn], axis=1).astype(f32)                             # (Din, 2H)
    c0 = jnp.stack([jnp.sum(h["wc"][0] * h["a1"][0]) for h in heads])              # (H,)
    score_bias = jnp.concatenate([c0, jnp.zeros((H,), f32)]).reshape(1, 2 * H)     # (1, 2H)
    sel = jnp.repeat(jnp.eye(H, dtype=f32), Fh, axis=1)                            # (H, H*Fh)
    ve = jnp.stack([h["W3"] @ h["a2"][1] for h in heads], axis=0)                  # (H, Fh)
    ve_blk = jnp.zeros((HF, H), f32)
    for i in range(H):                                                             # block-diag ve
        ve_blk = ve_blk.at[i * Fh:(i + 1) * Fh, i].set(ve[i])

    # binary incidence mask (exact in bf16) and its transpose, computed once in XLA
    mask = (Hm > 0).astype(bf16)                                                   # (B, E, N)
    maskT = jnp.swapaxes(mask, 1, 2)                                               # (B, N, E)

    kernel = functools.partial(fused_block_kernel, heads=H, fh=Fh)
    const = lambda b: (0, 0)

    # Rough live-VMEM estimate (activations, incidence, (N,E)/(E,N) temporaries, weights) used
    # to request the scoped-VMEM budget explicitly (v7x: 64 MiB physical / 32 MiB default).
    est = 4 * (4 * N * Din + 4 * E * HF + 3 * N * HF + 4 * N * E + 2 * E * N
               + 2 * Din * HF + 2 * Din * Din) + 65536
    vmem_limit = int(min(max(2 * est, 32 * 1024 * 1024), 96 * 1024 * 1024))

    return pl.pallas_call(
        kernel,
        out_shape=jax.ShapeDtypeStruct((B, N, Din), jnp.float32),
        grid=(B,),
        in_specs=[
            pl.BlockSpec((1, N, Din), lambda b: (b, 0, 0)),    # x (matmul input + residual)
            pl.BlockSpec((1, E, N), lambda b: (b, 0, 0)),      # incidence mask
            pl.BlockSpec((1, N, E), lambda b: (b, 0, 0)),      # transposed incidence mask
            pl.BlockSpec((Din, HF), const),                    # stacked transfer weights (bf16)
            pl.BlockSpec((Din, 2 * H), const),                 # folded score projections
            pl.BlockSpec((1, 2 * H), const),                   # score bias (c0 | 0)
            pl.BlockSpec((H, HF), const),                      # head -> lane-block expander
            pl.BlockSpec((HF, H), const),                      # block-diagonal ve
            pl.BlockSpec((HF, Din), const),                    # w_hm (bf16)
            pl.BlockSpec((1, Din), const),                     # b_hm
            pl.BlockSpec((1, Din), const),                     # ln gamma (shared LN)
            pl.BlockSpec((1, Din), const),                     # ln beta
            pl.BlockSpec((Din, Din), const),                   # w_f1 (bf16)
            pl.BlockSpec((1, Din), const),                     # b_f1
            pl.BlockSpec((Din, Din), const),                   # w_f2 (bf16)
            pl.BlockSpec((1, Din), const),                     # b_f2
            pl.BlockSpec((1, Din), const),                     # ffn ln gamma
            pl.BlockSpec((1, Din), const),                     # ffn ln beta
        ],
        out_specs=pl.BlockSpec((1, N, Din), lambda b: (b, 0, 0)),
        compiler_params=pltpu.CompilerParams(
            dimension_semantics=("parallel",),       # B >= 2 keeps both v7x TensorCores busy
            vmem_limit_bytes=vmem_limit),
    )(x, mask, maskT, W_all, vv, score_bias, sel, ve_blk,
      p["w_hm"].astype(bf16), p["b_hm"], p["ln_g"], p["ln_b"],
      p["w_f1"].astype(bf16), p["b_f1"], p["w_f2"].astype(bf16), p["b_f2"],
      p["ffn_ln_g"], p["ffn_ln_b"])


# ---------------------------------------------------------------------------
# Deterministic parameter init (synthetic; matches the shapes the module implies).
# ---------------------------------------------------------------------------
def init_head(key, din, fh):
    ks = jax.random.split(key, 6)
    sc = 0.1
    return {
        "W": jax.random.normal(ks[0], (din, fh), jnp.float32) * sc,
        "W2": jax.random.normal(ks[1], (din, fh), jnp.float32) * sc,
        "W3": jax.random.normal(ks[2], (fh, fh), jnp.float32) * sc,
        "a1": jax.random.normal(ks[3], (2, fh), jnp.float32) * sc,   # torch a  (2*fh, 1) reshaped
        "a2": jax.random.normal(ks[4], (2, fh), jnp.float32) * sc,   # torch a2 (2*fh, 1) reshaped
        "wc": jax.random.normal(ks[5], (1, fh), jnp.float32) * sc,   # word_context embedding
    }


def init_block(key, din, head_num, fh):
    ks = jax.random.split(key, head_num + 4)
    sc = 0.1
    heads = [init_head(ks[i], din, fh) for i in range(head_num)]
    return {
        "heads": heads,
        "w_hm": jax.random.normal(ks[head_num + 0], (head_num * fh, din), jnp.float32) * sc,
        "b_hm": jnp.zeros((1, din), jnp.float32),
        "ln_g": jnp.ones((1, din), jnp.float32),
        "ln_b": jnp.zeros((1, din), jnp.float32),
        "w_f1": jax.random.normal(ks[head_num + 1], (din, din), jnp.float32) * sc,
        "b_f1": jnp.zeros((1, din), jnp.float32),
        "w_f2": jax.random.normal(ks[head_num + 2], (din, din), jnp.float32) * sc,
        "b_f2": jnp.zeros((1, din), jnp.float32),
        "ffn_ln_g": jnp.ones((1, din), jnp.float32),
        "ffn_ln_b": jnp.zeros((1, din), jnp.float32),
    }


if __name__ == "__main__":
    B, N, E = 2, 16, 8
    input_size, head_num, head_hid = 32, 2, 16

    key = jax.random.PRNGKey(0)
    kx, kh, kp = jax.random.split(key, 3)
    x = jax.random.normal(kx, (B, N, input_size), jnp.float32)
    Hm = (jax.random.uniform(kh, (B, E, N)) > 0.5).astype(jnp.float32)   # incidence: edges x nodes

    params = init_block(kp, input_size, head_num, head_hid)

    fwd = jax.jit(hyper_atten_block)
    out = fwd(x, Hm, params)
    jax.block_until_ready(out)

    assert out.shape == (B, N, input_size)
    assert bool(jnp.all(jnp.isfinite(out)))
    print("KERNEL_OK")
</pallas_src>

<mosaic_0001>
module attributes {stable_mosaic.version = 11 : i64} {
  func.func @fused_block_kernel(%arg0: i32, %arg1: memref<1x16x32xf32, #tpu.memory_space<vmem>>, %arg2: memref<1x8x16xbf16, #tpu.memory_space<vmem>>, %arg3: memref<1x16x8xbf16, #tpu.memory_space<vmem>>, %arg4: memref<32x32xbf16, #tpu.memory_space<vmem>>, %arg5: memref<32x4xf32, #tpu.memory_space<vmem>>, %arg6: memref<1x4xf32, #tpu.memory_space<vmem>>, %arg7: memref<2x32xf32, #tpu.memory_space<vmem>>, %arg8: memref<32x2xf32, #tpu.memory_space<vmem>>, %arg9: memref<32x32xbf16, #tpu.memory_space<vmem>>, %arg10: memref<1x32xf32, #tpu.memory_space<vmem>>, %arg11: memref<1x32xf32, #tpu.memory_space<vmem>>, %arg12: memref<1x32xf32, #tpu.memory_space<vmem>>, %arg13: memref<32x32xbf16, #tpu.memory_space<vmem>>, %arg14: memref<1x32xf32, #tpu.memory_space<vmem>>, %arg15: memref<32x32xbf16, #tpu.memory_space<vmem>>, %arg16: memref<1x32xf32, #tpu.memory_space<vmem>>, %arg17: memref<1x32xf32, #tpu.memory_space<vmem>>, %arg18: memref<1x32xf32, #tpu.memory_space<vmem>>, %arg19: memref<1x16x32xf32, #tpu.memory_space<vmem>>) attributes {dimension_semantics = [#tpu.dimension_semantics<parallel>], iteration_bounds = array<i64: 2>, scalar_prefetch = 0 : i64, scratch_operands = 0 : i64, tpu.core_type = #tpu.core_type<tc>, window_params = [{transform_indices = @transform_0, window_bounds = array<i64: 1, 16, 32>}, {transform_indices = @transform_1, window_bounds = array<i64: 1, 8, 16>}, {transform_indices = @transform_2, window_bounds = array<i64: 1, 16, 8>}, {pipeline_mode = #tpu.pipeline_mode<synchronous>, transform_indices = @transform_3, window_bounds = array<i64: 32, 32>}, {pipeline_mode = #tpu.pipeline_mode<synchronous>, transform_indices = @transform_4, window_bounds = array<i64: 32, 4>}, {pipeline_mode = #tpu.pipeline_mode<synchronous>, transform_indices = @transform_5, window_bounds = array<i64: 1, 4>}, {pipeline_mode = #tpu.pipeline_mode<synchronous>, transform_indices = @transform_6, window_bounds = array<i64: 2, 32>}, {pipeline_mode = #tpu.pipeline_mode<synchronous>, transform_indices = @transform_7, window_bounds = array<i64: 32, 2>}, {pipeline_mode = #tpu.pipeline_mode<synchronous>, transform_indices = @transform_8, window_bounds = array<i64: 32, 32>}, {pipeline_mode = #tpu.pipeline_mode<synchronous>, transform_indices = @transform_9, window_bounds = array<i64: 1, 32>}, {pipeline_mode = #tpu.pipeline_mode<synchronous>, transform_indices = @transform_10, window_bounds = array<i64: 1, 32>}, {pipeline_mode = #tpu.pipeline_mode<synchronous>, transform_indices = @transform_11, window_bounds = array<i64: 1, 32>}, {pipeline_mode = #tpu.pipeline_mode<synchronous>, transform_indices = @transform_12, window_bounds = array<i64: 32, 32>}, {pipeline_mode = #tpu.pipeline_mode<synchronous>, transform_indices = @transform_13, window_bounds = array<i64: 1, 32>}, {pipeline_mode = #tpu.pipeline_mode<synchronous>, transform_indices = @transform_14, window_bounds = array<i64: 32, 32>}, {pipeline_mode = #tpu.pipeline_mode<synchronous>, transform_indices = @transform_15, window_bounds = array<i64: 1, 32>}, {pipeline_mode = #tpu.pipeline_mode<synchronous>, transform_indices = @transform_16, window_bounds = array<i64: 1, 32>}, {pipeline_mode = #tpu.pipeline_mode<synchronous>, transform_indices = @transform_17, window_bounds = array<i64: 1, 32>}, {transform_indices = @transform_18, window_bounds = array<i64: 1, 16, 32>}]} {
    %c0 = arith.constant 0 : index
    %c0_0 = arith.constant 0 : index
    %c0_1 = arith.constant 0 : index
    %0 = vector.load %arg1[%c0, %c0_0, %c0_1] : memref<1x16x32xf32, #tpu.memory_space<vmem>>, vector<1x16x32xf32>
    %1 = vector.shape_cast %0 : vector<1x16x32xf32> to vector<16x32xf32>
    %c0_2 = arith.constant 0 : index
    %c0_3 = arith.constant 0 : index
    %c0_4 = arith.constant 0 : index
    %2 = vector.load %arg2[%c0_2, %c0_3, %c0_4] : memref<1x8x16xbf16, #tpu.memory_space<vmem>>, vector<1x8x16xbf16>
    %3 = vector.shape_cast %2 : vector<1x8x16xbf16> to vector<8x16xbf16>
    %c0_5 = arith.constant 0 : index
    %c0_6 = arith.constant 0 : index
    %c0_7 = arith.constant 0 : index
    %4 = vector.load %arg3[%c0_5, %c0_6, %c0_7] : memref<1x16x8xbf16, #tpu.memory_space<vmem>>, vector<1x16x8xbf16>
    %5 = vector.shape_cast %4 : vector<1x16x8xbf16> to vector<16x8xbf16>
    %c0_8 = arith.constant 0 : index
    %c0_9 = arith.constant 0 : index
    %6 = vector.load %arg7[%c0_8, %c0_9] : memref<2x32xf32, #tpu.memory_space<vmem>>, vector<2x32xf32>
    %7 = arith.truncf %1 : vector<16x32xf32> to vector<16x32xbf16>
    %c0_10 = arith.constant 0 : index
    %c0_11 = arith.constant 0 : index
    %8 = vector.load %arg4[%c0_10, %c0_11] : memref<32x32xbf16, #tpu.memory_space<vmem>>, vector<32x32xbf16>
    %cst = arith.constant dense<0.000000e+00> : vector<16x32xf32>
    %9 = tpu.matmul %7, %8, %cst {dimension_numbers = #tpu.dot_dimension_numbers<[1], [0], [0], [1], [0, 0, 1, 1], [], []>} : vector<16x32xbf16>, vector<32x32xbf16>, vector<16x32xf32> -> vector<16x32xf32>
    %c0_12 = arith.constant 0 : index
    %c0_13 = arith.constant 0 : index
    %10 = vector.load %arg5[%c0_12, %c0_13] : memref<32x4xf32, #tpu.memory_space<vmem>>, vector<32x4xf32>
    %cst_14 = arith.constant dense<0.000000e+00> : vector<16x4xf32>
    %11 = tpu.matmul %1, %10, %cst_14 {dimension_numbers = #tpu.dot_dimension_numbers<[1], [0], [0], [1], [0, 0, 1, 1], [], []>} : vector<16x32xf32>, vector<32x4xf32>, vector<16x4xf32> -> vector<16x4xf32>
    %c0_15 = arith.constant 0 : index
    %c0_16 = arith.constant 0 : index
    %12 = vector.load %arg6[%c0_15, %c0_16] : memref<1x4xf32, #tpu.memory_space<vmem>>, vector<1x4xf32>
    %13 = vector.broadcast %12 : vector<1x4xf32> to vector<16x4xf32>
    %14 = arith.addf %11, %13 : vector<16x4xf32>
    %15 = vector.extract_strided_slice %14 {offsets = [0, 0], sizes = [16, 2], strides = [1, 1]} : vector<16x4xf32> to vector<16x2xf32>
    %16 = vector.extract_strided_slice %14 {offsets = [0, 2], sizes = [16, 2], strides = [1, 1]} : vector<16x4xf32> to vector<16x2xf32>
    %cst_17 = arith.constant 0.000000e+00 : f32
    %17 = vector.broadcast %cst_17 : f32 to vector<16x2xf32>
    %18 = arith.cmpf ogt, %15, %17 : vector<16x2xf32>
    %cst_18 = arith.constant 2.000000e-01 : f32
    %19 = vector.broadcast %cst_18 : f32 to vector<16x2xf32>
    %20 = arith.mulf %19, %15 : vector<16x2xf32>
    %21 = arith.select %18, %15, %20 : vector<16x2xi1>, vector<16x2xf32>
    %cst_19 = arith.constant dense<0xFF800000> : vector<2xf32>
    %22 = vector.multi_reduction <maximumf>, %21, %cst_19 [0] : vector<16x2xf32> to vector<2xf32>
    %23 = vector.shape_cast %22 : vector<2xf32> to vector<1x2xf32>
    %24 = vector.broadcast %23 : vector<1x2xf32> to vector<16x2xf32>
    %25 = arith.subf %21, %24 : vector<16x2xf32>
    %26 = math.exp %25 : vector<16x2xf32>
    %cst_20 = arith.constant dense<0.000000e+00> : vector<16x32xf32>
    %27 = tpu.matmul %26, %6, %cst_20 {dimension_numbers = #tpu.dot_dimension_numbers<[1], [0], [0], [1], [0, 0, 1, 1], [], []>} : vector<16x2xf32>, vector<2x32xf32>, vector<16x32xf32> -> vector<16x32xf32>
    %28 = arith.mulf %27, %9 : vector<16x32xf32>
    %29 = arith.truncf %28 : vector<16x32xf32> to vector<16x32xbf16>
    %cst_21 = arith.constant dense<0.000000e+00> : vector<8x32xf32>
    %30 = tpu.matmul %3, %29, %cst_21 {dimension_numbers = #tpu.dot_dimension_numbers<[1], [0], [0], [1], [0, 0, 1, 1], [], []>} : vector<8x16xbf16>, vector<16x32xbf16>, vector<8x32xf32> -> vector<8x32xf32>
    %31 = arith.truncf %26 : vector<16x2xf32> to vector<16x2xbf16>
    %cst_22 = arith.constant dense<0.000000e+00> : vector<8x2xf32>
    %32 = tpu.matmul %3, %31, %cst_22 {dimension_numbers = #tpu.dot_dimension_numbers<[1], [0], [0], [1], [0, 0, 1, 1], [], []>} : vector<8x16xbf16>, vector<16x2xbf16>, vector<8x2xf32> -> vector<8x2xf32>
    %cst_23 = arith.constant 9.99999968E-21 : f32
    %33 = vector.broadcast %cst_23 : f32 to vector<8x2xf32>
    %34 = arith.addf %32, %33 : vector<8x2xf32>
    %35 = tpu.reciprocal %34 {approx = true} : vector<8x2xf32> -> vector<8x2xf32>
    %cst_24 = arith.constant dense<0.000000e+00> : vector<8x32xf32>
    %36 = tpu.matmul %35, %6, %cst_24 {dimension_numbers = #tpu.dot_dimension_numbers<[1], [0], [0], [1], [0, 0, 1, 1], [], []>} : vector<8x2xf32>, vector<2x32xf32>, vector<8x32xf32> -> vector<8x32xf32>
    %37 = arith.mulf %30, %36 : vector<8x32xf32>
    %c0_25 = arith.constant 0 : index
    %c0_26 = arith.constant 0 : index
    %38 = vector.load %arg8[%c0_25, %c0_26] : memref<32x2xf32, #tpu.memory_space<vmem>>, vector<32x2xf32>
    %cst_27 = arith.constant dense<0.000000e+00> : vector<8x2xf32>
    %39 = tpu.matmul %37, %38, %cst_27 {dimension_numbers = #tpu.dot_dimension_numbers<[1], [0], [0], [1], [0, 0, 1, 1], [], []>} : vector<8x32xf32>, vector<32x2xf32>, vector<8x2xf32> -> vector<8x2xf32>
    %c0_28 = arith.constant 0 : index
    %c0_29 = arith.constant 0 : index
    %40 = vector.load %arg9[%c0_28, %c0_29] : memref<32x32xbf16, #tpu.memory_space<vmem>>, vector<32x32xbf16>
    %cst_30 = arith.constant 0.000000e+00 : f32
    %41 = vector.broadcast %cst_30 : f32 to vector<16x32xf32>
    %42 = vector.extract_strided_slice %16 {offsets = [0, 0], sizes = [16, 1], strides = [1, 1]} : vector<16x2xf32> to vector<16x1xf32>
    %43 = vector.extract_strided_slice %39 {offsets = [0, 0], sizes = [8, 1], strides = [1, 1]} : vector<8x2xf32> to vector<8x1xf32>
    %44 = tpu.transpose %43, [1, 0] : vector<8x1xf32> -> vector<1x8xf32>
    %45 = vector.broadcast %42 : vector<16x1xf32> to vector<16x8xf32>
    %46 = vector.broadcast %44 : vector<1x8xf32> to vector<16x8xf32>
    %47 = arith.addf %45, %46 : vector<16x8xf32>
    %cst_31 = arith.constant 0.000000e+00 : f32
    %48 = vector.broadcast %cst_31 : f32 to vector<16x8xf32>
    %49 = arith.cmpf ogt, %47, %48 : vector<16x8xf32>
    %cst_32 = arith.constant 2.000000e-01 : f32
    %50 = vector.broadcast %cst_32 : f32 to vector<16x8xf32>
    %51 = arith.mulf %50, %47 : vector<16x8xf32>
    %52 = arith.select %49, %47, %51 : vector<16x8xi1>, vector<16x8xf32>
    %cst_33 = arith.constant 0.000000e+00 : bf16
    %53 = vector.broadcast %cst_33 : bf16 to vector<16x8xbf16>
    %54 = arith.cmpf ogt, %5, %53 : vector<16x8xbf16>
    %cst_34 = arith.constant -9.000000e+15 : f32
    %55 = vector.broadcast %cst_34 : f32 to vector<16x8xf32>
    %56 = arith.select %54, %52, %55 : vector<16x8xi1>, vector<16x8xf32>
    %cst_35 = arith.constant dense<0xFF800000> : vector<16xf32>
    %57 = vector.multi_reduction <maximumf>, %56, %cst_35 [1] : vector<16x8xf32> to vector<16xf32>
    %58 = vector.shape_cast %57 : vector<16xf32> to vector<16x1xf32>
    %59 = vector.broadcast %58 : vector<16x1xf32> to vector<16x8xf32>
    %60 = arith.subf %56, %59 : vector<16x8xf32>
    %61 = math.exp %60 : vector<16x8xf32>
    %cst_36 = arith.constant dense<0.000000e+00> : vector<16xf32>
    %62 = vector.multi_reduction <add>, %61, %cst_36 [1] : vector<16x8xf32> to vector<16xf32>
    %63 = vector.shape_cast %62 : vector<16xf32> to vector<16x1xf32>
    %64 = tpu.reciprocal %63 {approx = true} : vector<16x1xf32> -> vector<16x1xf32>
    %65 = vector.broadcast %64 : vector<16x1xf32> to vector<16x8xf32>
    %66 = arith.mulf %61, %65 : vector<16x8xf32>
    %67 = arith.truncf %66 : vector<16x8xf32> to vector<16x8xbf16>
    %68 = vector.extract_strided_slice %37 {offsets = [0, 0], sizes = [8, 16], strides = [1, 1]} : vector<8x32xf32> to vector<8x16xf32>
    %69 = arith.truncf %68 : vector<8x16xf32> to vector<8x16xbf16>
    %cst_37 = arith.constant dense<0.000000e+00> : vector<16x16xf32>
    %70 = tpu.matmul %67, %69, %cst_37 {dimension_numbers = #tpu.dot_dimension_numbers<[1], [0], [0], [1], [0, 0, 1, 1], [], []>} : vector<16x8xbf16>, vector<8x16xbf16>, vector<16x16xf32> -> vector<16x16xf32>
    %cst_38 = arith.constant 0.000000e+00 : f32
    %71 = vector.broadcast %cst_38 : f32 to vector<16x16xf32>
    %72 = arith.cmpf ogt, %70, %71 : vector<16x16xf32>
    %cst_39 = arith.constant 0.000000e+00 : f32
    %73 = vector.broadcast %cst_39 : f32 to vector<16x16xf32>
    %74 = arith.minimumf %70, %73 : vector<16x16xf32>
    %75 = math.exp %74 : vector<16x16xf32>
    %cst_40 = arith.constant 1.000000e+00 : f32
    %76 = vector.broadcast %cst_40 : f32 to vector<16x16xf32>
    %77 = arith.subf %75, %76 : vector<16x16xf32>
    %78 = arith.select %72, %70, %77 : vector<16x16xi1>, vector<16x16xf32>
    %79 = arith.truncf %78 : vector<16x16xf32> to vector<16x16xbf16>
    %80 = vector.extract_strided_slice %40 {offsets = [0, 0], sizes = [16, 32], strides = [1, 1]} : vector<32x32xbf16> to vector<16x32xbf16>
    %cst_41 = arith.constant dense<0.000000e+00> : vector<16x32xf32>
    %81 = tpu.matmul %79, %80, %cst_41 {dimension_numbers = #tpu.dot_dimension_numbers<[1], [0], [0], [1], [0, 0, 1, 1], [], []>} : vector<16x16xbf16>, vector<16x32xbf16>, vector<16x32xf32> -> vector<16x32xf32>
    %82 = arith.addf %41, %81 : vector<16x32xf32>
    %83 = vector.extract_strided_slice %16 {offsets = [0, 1], sizes = [16, 1], strides = [1, 1]} : vector<16x2xf32> to vector<16x1xf32>
    %84 = vector.extract_strided_slice %39 {offsets = [0, 1], sizes = [8, 1], strides = [1, 1]} : vector<8x2xf32> to vector<8x1xf32>
    %85 = tpu.transpose %84, [1, 0] : vector<8x1xf32> -> vector<1x8xf32>
    %86 = vector.broadcast %83 : vector<16x1xf32> to vector<16x8xf32>
    %87 = vector.broadcast %85 : vector<1x8xf32> to vector<16x8xf32>
    %88 = arith.addf %86, %87 : vector<16x8xf32>
    %cst_42 = arith.constant 0.000000e+00 : f32
    %89 = vector.broadcast %cst_42 : f32 to vector<16x8xf32>
    %90 = arith.cmpf ogt, %88, %89 : vector<16x8xf32>
    %cst_43 = arith.constant 2.000000e-01 : f32
    %91 = vector.broadcast %cst_43 : f32 to vector<16x8xf32>
    %92 = arith.mulf %91, %88 : vector<16x8xf32>
    %93 = arith.select %90, %88, %92 : vector<16x8xi1>, vector<16x8xf32>
    %cst_44 = arith.constant 0.000000e+00 : bf16
    %94 = vector.broadcast %cst_44 : bf16 to vector<16x8xbf16>
    %95 = arith.cmpf ogt, %5, %94 : vector<16x8xbf16>
    %cst_45 = arith.constant -9.000000e+15 : f32
    %96 = vector.broadcast %cst_45 : f32 to vector<16x8xf32>
    %97 = arith.select %95, %93, %96 : vector<16x8xi1>, vector<16x8xf32>
    %cst_46 = arith.constant dense<0xFF800000> : vector<16xf32>
    %98 = vector.multi_reduction <maximumf>, %97, %cst_46 [1] : vector<16x8xf32> to vector<16xf32>
    %99 = vector.shape_cast %98 : vector<16xf32> to vector<16x1xf32>
    %100 = vector.broadcast %99 : vector<16x1xf32> to vector<16x8xf32>
    %101 = arith.subf %97, %100 : vector<16x8xf32>
    %102 = math.exp %101 : vector<16x8xf32>
    %cst_47 = arith.constant dense<0.000000e+00> : vector<16xf32>
    %103 = vector.multi_reduction <add>, %102, %cst_47 [1] : vector<16x8xf32> to vector<16xf32>
    %104 = vector.shape_cast %103 : vector<16xf32> to vector<16x1xf32>
    %105 = tpu.reciprocal %104 {approx = true} : vector<16x1xf32> -> vector<16x1xf32>
    %106 = vector.broadcast %105 : vector<16x1xf32> to vector<16x8xf32>
    %107 = arith.mulf %102, %106 : vector<16x8xf32>
    %108 = arith.truncf %107 : vector<16x8xf32> to vector<16x8xbf16>
    %109 = vector.extract_strided_slice %37 {offsets = [0, 16], sizes = [8, 16], strides = [1, 1]} : vector<8x32xf32> to vector<8x16xf32>
    %110 = arith.truncf %109 : vector<8x16xf32> to vector<8x16xbf16>
    %cst_48 = arith.constant dense<0.000000e+00> : vector<16x16xf32>
    %111 = tpu.matmul %108, %110, %cst_48 {dimension_numbers = #tpu.dot_dimension_numbers<[1], [0], [0], [1], [0, 0, 1, 1], [], []>} : vector<16x8xbf16>, vector<8x16xbf16>, vector<16x16xf32> -> vector<16x16xf32>
    %cst_49 = arith.constant 0.000000e+00 : f32
    %112 = vector.broadcast %cst_49 : f32 to vector<16x16xf32>
    %113 = arith.cmpf ogt, %111, %112 : vector<16x16xf32>
    %cst_50 = arith.constant 0.000000e+00 : f32
    %114 = vector.broadcast %cst_50 : f32 to vector<16x16xf32>
    %115 = arith.minimumf %111, %114 : vector<16x16xf32>
    %116 = math.exp %115 : vector<16x16xf32>
    %cst_51 = arith.constant 1.000000e+00 : f32
    %117 = vector.broadcast %cst_51 : f32 to vector<16x16xf32>
    %118 = arith.subf %116, %117 : vector<16x16xf32>
    %119 = arith.select %113, %111, %118 : vector<16x16xi1>, vector<16x16xf32>
    %120 = arith.truncf %119 : vector<16x16xf32> to vector<16x16xbf16>
    %121 = vector.extract_strided_slice %40 {offsets = [16, 0], sizes = [16, 32], strides = [1, 1]} : vector<32x32xbf16> to vector<16x32xbf16>
    %cst_52 = arith.constant dense<0.000000e+00> : vector<16x32xf32>
    %122 = tpu.matmul %120, %121, %cst_52 {dimension_numbers = #tpu.dot_dimension_numbers<[1], [0], [0], [1], [0, 0, 1, 1], [], []>} : vector<16x16xbf16>, vector<16x32xbf16>, vector<16x32xf32> -> vector<16x32xf32>
    %123 = arith.addf %82, %122 : vector<16x32xf32>
    %c0_53 = arith.constant 0 : index
    %c0_54 = arith.constant 0 : index
    %124 = vector.load %arg11[%c0_53, %c0_54] : memref<1x32xf32, #tpu.memory_space<vmem>>, vector<1x32xf32>
    %c0_55 = arith.constant 0 : index
    %c0_56 = arith.constant 0 : index
    %125 = vector.load %arg12[%c0_55, %c0_56] : memref<1x32xf32, #tpu.memory_space<vmem>>, vector<1x32xf32>
    %c0_57 = arith.constant 0 : index
    %c0_58 = arith.constant 0 : index
    %126 = vector.load %arg10[%c0_57, %c0_58] : memref<1x32xf32, #tpu.memory_space<vmem>>, vector<1x32xf32>
    %127 = vector.broadcast %126 : vector<1x32xf32> to vector<16x32xf32>
    %128 = arith.addf %123, %127 : vector<16x32xf32>
    %cst_59 = arith.constant 0.000000e+00 : f32
    %129 = vector.broadcast %cst_59 : f32 to vector<16x32xf32>
    %130 = arith.cmpf ogt, %128, %129 : vector<16x32xf32>
    %cst_60 = arith.constant 0.00999999977 : f32
    %131 = vector.broadcast %cst_60 : f32 to vector<16x32xf32>
    %132 = arith.mulf %131, %128 : vector<16x32xf32>
    %133 = arith.select %130, %128, %132 : vector<16x32xi1>, vector<16x32xf32>
    %134 = arith.addf %133, %1 : vector<16x32xf32>
    %cst_61 = arith.constant dense<0.000000e+00> : vector<16xf32>
    %135 = vector.multi_reduction <add>, %134, %cst_61 [1] : vector<16x32xf32> to vector<16xf32>
    %136 = vector.shape_cast %135 : vector<16xf32> to vector<16x1xf32>
    %cst_62 = arith.constant 3.200000e+01 : f32
    %137 = vector.broadcast %cst_62 : f32 to vector<16x1xf32>
    %138 = arith.divf %136, %137 : vector<16x1xf32>
    %139 = vector.broadcast %138 : vector<16x1xf32> to vector<16x32xf32>
    %140 = arith.subf %134, %139 : vector<16x32xf32>
    %141 = vector.broadcast %138 : vector<16x1xf32> to vector<16x32xf32>
    %142 = arith.subf %134, %141 : vector<16x32xf32>
    %143 = arith.mulf %140, %142 : vector<16x32xf32>
    %cst_63 = arith.constant dense<0.000000e+00> : vector<16xf32>
    %144 = vector.multi_reduction <add>, %143, %cst_63 [1] : vector<16x32xf32> to vector<16xf32>
    %145 = vector.shape_cast %144 : vector<16xf32> to vector<16x1xf32>
    %cst_64 = arith.constant 3.200000e+01 : f32
    %146 = vector.broadcast %cst_64 : f32 to vector<16x1xf32>
    %147 = arith.divf %145, %146 : vector<16x1xf32>
    %148 = vector.broadcast %138 : vector<16x1xf32> to vector<16x32xf32>
    %149 = arith.subf %134, %148 : vector<16x32xf32>
    %cst_65 = arith.constant 9.99999974E-6 : f32
    %150 = vector.broadcast %cst_65 : f32 to vector<16x1xf32>
    %151 = arith.addf %147, %150 : vector<16x1xf32>
    %152 = math.rsqrt %151 : vector<16x1xf32>
    %153 = vector.broadcast %152 : vector<16x1xf32> to vector<16x32xf32>
    %154 = arith.mulf %149, %153 : vector<16x32xf32>
    %155 = vector.broadcast %124 : vector<1x32xf32> to vector<16x32xf32>
    %156 = arith.mulf %154, %155 : vector<16x32xf32>
    %157 = vector.broadcast %125 : vector<1x32xf32> to vector<16x32xf32>
    %158 = arith.addf %156, %157 : vector<16x32xf32>
    %159 = arith.truncf %158 : vector<16x32xf32> to vector<16x32xbf16>
    %c0_66 = arith.constant 0 : index
    %c0_67 = arith.constant 0 : index
    %160 = vector.load %arg13[%c0_66, %c0_67] : memref<32x32xbf16, #tpu.memory_space<vmem>>, vector<32x32xbf16>
    %cst_68 = arith.constant dense<0.000000e+00> : vector<16x32xf32>
    %161 = tpu.matmul %159, %160, %cst_68 {dimension_numbers = #tpu.dot_dimension_numbers<[1], [0], [0], [1], [0, 0, 1, 1], [], []>} : vector<16x32xbf16>, vector<32x32xbf16>, vector<16x32xf32> -> vector<16x32xf32>
    %c0_69 = arith.constant 0 : index
    %c0_70 = arith.constant 0 : index
    %162 = vector.load %arg14[%c0_69, %c0_70] : memref<1x32xf32, #tpu.memory_space<vmem>>, vector<1x32xf32>
    %163 = vector.broadcast %162 : vector<1x32xf32> to vector<16x32xf32>
    %164 = arith.addf %161, %163 : vector<16x32xf32>
    %cst_71 = arith.constant 0.000000e+00 : f32
    %165 = vector.broadcast %cst_71 : f32 to vector<16x32xf32>
    %166 = arith.cmpf ogt, %164, %165 : vector<16x32xf32>
    %cst_72 = arith.constant 0.00999999977 : f32
    %167 = vector.broadcast %cst_72 : f32 to vector<16x32xf32>
    %168 = arith.mulf %167, %164 : vector<16x32xf32>
    %169 = arith.select %166, %164, %168 : vector<16x32xi1>, vector<16x32xf32>
    %170 = arith.truncf %169 : vector<16x32xf32> to vector<16x32xbf16>
    %c0_73 = arith.constant 0 : index
    %c0_74 = arith.constant 0 : index
    %171 = vector.load %arg15[%c0_73, %c0_74] : memref<32x32xbf16, #tpu.memory_space<vmem>>, vector<32x32xbf16>
    %cst_75 = arith.constant dense<0.000000e+00> : vector<16x32xf32>
    %172 = tpu.matmul %170, %171, %cst_75 {dimension_numbers = #tpu.dot_dimension_numbers<[1], [0], [0], [1], [0, 0, 1, 1], [], []>} : vector<16x32xbf16>, vector<32x32xbf16>, vector<16x32xf32> -> vector<16x32xf32>
    %c0_76 = arith.constant 0 : index
    %c0_77 = arith.constant 0 : index
    %173 = vector.load %arg16[%c0_76, %c0_77] : memref<1x32xf32, #tpu.memory_space<vmem>>, vector<1x32xf32>
    %174 = vector.broadcast %173 : vector<1x32xf32> to vector<16x32xf32>
    %175 = arith.addf %172, %174 : vector<16x32xf32>
    %cst_78 = arith.constant 0.000000e+00 : f32
    %176 = vector.broadcast %cst_78 : f32 to vector<16x32xf32>
    %177 = arith.cmpf ogt, %175, %176 : vector<16x32xf32>
    %cst_79 = arith.constant 0.00999999977 : f32
    %178 = vector.broadcast %cst_79 : f32 to vector<16x32xf32>
    %179 = arith.mulf %178, %175 : vector<16x32xf32>
    %180 = arith.select %177, %175, %179 : vector<16x32xi1>, vector<16x32xf32>
    %c0_80 = arith.constant 0 : index
    %c0_81 = arith.constant 0 : index
    %181 = vector.load %arg17[%c0_80, %c0_81] : memref<1x32xf32, #tpu.memory_space<vmem>>, vector<1x32xf32>
    %c0_82 = arith.constant 0 : index
    %c0_83 = arith.constant 0 : index
    %182 = vector.load %arg18[%c0_82, %c0_83] : memref<1x32xf32, #tpu.memory_space<vmem>>, vector<1x32xf32>
    %cst_84 = arith.constant dense<0.000000e+00> : vector<16xf32>
    %183 = vector.multi_reduction <add>, %180, %cst_84 [1] : vector<16x32xf32> to vector<16xf32>
    %184 = vector.shape_cast %183 : vector<16xf32> to vector<16x1xf32>
    %cst_85 = arith.constant 3.200000e+01 : f32
    %185 = vector.broadcast %cst_85 : f32 to vector<16x1xf32>
    %186 = arith.divf %184, %185 : vector<16x1xf32>
    %187 = vector.broadcast %186 : vector<16x1xf32> to vector<16x32xf32>
    %188 = arith.subf %180, %187 : vector<16x32xf32>
    %189 = vector.broadcast %186 : vector<16x1xf32> to vector<16x32xf32>
    %190 = arith.subf %180, %189 : vector<16x32xf32>
    %191 = arith.mulf %188, %190 : vector<16x32xf32>
    %cst_86 = arith.constant dense<0.000000e+00> : vector<16xf32>
    %192 = vector.multi_reduction <add>, %191, %cst_86 [1] : vector<16x32xf32> to vector<16xf32>
    %193 = vector.shape_cast %192 : vector<16xf32> to vector<16x1xf32>
    %cst_87 = arith.constant 3.200000e+01 : f32
    %194 = vector.broadcast %cst_87 : f32 to vector<16x1xf32>
    %195 = arith.divf %193, %194 : vector<16x1xf32>
    %196 = vector.broadcast %186 : vector<16x1xf32> to vector<16x32xf32>
    %197 = arith.subf %180, %196 : vector<16x32xf32>
    %cst_88 = arith.constant 9.99999974E-6 : f32
    %198 = vector.broadcast %cst_88 : f32 to vector<16x1xf32>
    %199 = arith.addf %195, %198 : vector<16x1xf32>
    %200 = math.rsqrt %199 : vector<16x1xf32>
    %201 = vector.broadcast %200 : vector<16x1xf32> to vector<16x32xf32>
    %202 = arith.mulf %197, %201 : vector<16x32xf32>
    %203 = vector.broadcast %181 : vector<1x32xf32> to vector<16x32xf32>
    %204 = arith.mulf %202, %203 : vector<16x32xf32>
    %205 = vector.broadcast %182 : vector<1x32xf32> to vector<16x32xf32>
    %206 = arith.addf %204, %205 : vector<16x32xf32>
    %207 = arith.addf %206, %158 : vector<16x32xf32>
    %cst_89 = arith.constant dense<0.000000e+00> : vector<16xf32>
    %208 = vector.multi_reduction <add>, %207, %cst_89 [1] : vector<16x32xf32> to vector<16xf32>
    %209 = vector.shape_cast %208 : vector<16xf32> to vector<16x1xf32>
    %cst_90 = arith.constant 3.200000e+01 : f32
    %210 = vector.broadcast %cst_90 : f32 to vector<16x1xf32>
    %211 = arith.divf %209, %210 : vector<16x1xf32>
    %212 = vector.broadcast %211 : vector<16x1xf32> to vector<16x32xf32>
    %213 = arith.subf %207, %212 : vector<16x32xf32>
    %214 = vector.broadcast %211 : vector<16x1xf32> to vector<16x32xf32>
    %215 = arith.subf %207, %214 : vector<16x32xf32>
    %216 = arith.mulf %213, %215 : vector<16x32xf32>
    %cst_91 = arith.constant dense<0.000000e+00> : vector<16xf32>
    %217 = vector.multi_reduction <add>, %216, %cst_91 [1] : vector<16x32xf32> to vector<16xf32>
    %218 = vector.shape_cast %217 : vector<16xf32> to vector<16x1xf32>
    %cst_92 = arith.constant 3.200000e+01 : f32
    %219 = vector.broadcast %cst_92 : f32 to vector<16x1xf32>
    %220 = arith.divf %218, %219 : vector<16x1xf32>
    %221 = vector.broadcast %211 : vector<16x1xf32> to vector<16x32xf32>
    %222 = arith.subf %207, %221 : vector<16x32xf32>
    %cst_93 = arith.constant 9.99999974E-6 : f32
    %223 = vector.broadcast %cst_93 : f32 to vector<16x1xf32>
    %224 = arith.addf %220, %223 : vector<16x1xf32>
    %225 = math.rsqrt %224 : vector<16x1xf32>
    %226 = vector.broadcast %225 : vector<16x1xf32> to vector<16x32xf32>
    %227 = arith.mulf %222, %226 : vector<16x32xf32>
    %228 = vector.broadcast %124 : vector<1x32xf32> to vector<16x32xf32>
    %229 = arith.mulf %227, %228 : vector<16x32xf32>
    %230 = vector.broadcast %125 : vector<1x32xf32> to vector<16x32xf32>
    %231 = arith.addf %229, %230 : vector<16x32xf32>
    %c0_94 = arith.constant 0 : index
    %c0_95 = arith.constant 0 : index
    %c0_96 = arith.constant 0 : index
    %232 = vector.load %arg19[%c0_94, %c0_95, %c0_96] : memref<1x16x32xf32, #tpu.memory_space<vmem>>, vector<1x16x32xf32>
    %233 = vector.shape_cast %232 : vector<1x16x32xf32> to vector<16x32xf32>
    %234 = vector.shape_cast %231 : vector<16x32xf32> to vector<1x16x32xf32>
    tpu.vector_store %arg19[%c0_94, %c0_95, %c0_96], %234 {strides = array<i32>} : memref<1x16x32xf32, #tpu.memory_space<vmem>>, vector<1x16x32xf32>,
    return
  }
  func.func @transform_0(%arg0: i32) -> (i32, i32, i32) {
    %c0_i32 = arith.constant 0 : i32
    %c0_i32_0 = arith.constant 0 : i32
    %c0_i32_1 = arith.constant 0 : i32
    return %arg0, %c0_i32, %c0_i32_0 : i32, i32, i32
  }
  func.func @transform_1(%arg0: i32) -> (i32, i32, i32) {
    %c0_i32 = arith.constant 0 : i32
    %c0_i32_0 = arith.constant 0 : i32
    %c0_i32_1 = arith.constant 0 : i32
    return %arg0, %c0_i32, %c0_i32_0 : i32, i32, i32
  }
  func.func @transform_2(%arg0: i32) -> (i32, i32, i32) {
    %c0_i32 = arith.constant 0 : i32
    %c0_i32_0 = arith.constant 0 : i32
    %c0_i32_1 = arith.constant 0 : i32
    return %arg0, %c0_i32, %c0_i32_0 : i32, i32, i32
  }
  func.func @transform_3(%arg0: i32) -> (i32, i32) {
    %c0_i32 = arith.constant 0 : i32
    %c0_i32_0 = arith.constant 0 : i32
    %c0_i32_1 = arith.constant 0 : i32
    return %c0_i32, %c0_i32_0 : i32, i32
  }
  func.func @transform_4(%arg0: i32) -> (i32, i32) {
    %c0_i32 = arith.constant 0 : i32
    %c0_i32_0 = arith.constant 0 : i32
    %c0_i32_1 = arith.constant 0 : i32
    return %c0_i32, %c0_i32_0 : i32, i32
  }
  func.func @transform_5(%arg0: i32) -> (i32, i32) {
    %c0_i32 = arith.constant 0 : i32
    %c0_i32_0 = arith.constant 0 : i32
    %c0_i32_1 = arith.constant 0 : i32
    return %c0_i32, %c0_i32_0 : i32, i32
  }
  func.func @transform_6(%arg0: i32) -> (i32, i32) {
    %c0_i32 = arith.constant 0 : i32
    %c0_i32_0 = arith.constant 0 : i32
    %c0_i32_1 = arith.constant 0 : i32
    return %c0_i32, %c0_i32_0 : i32, i32
  }
  func.func @transform_7(%arg0: i32) -> (i32, i32) {
    %c0_i32 = arith.constant 0 : i32
    %c0_i32_0 = arith.constant 0 : i32
    %c0_i32_1 = arith.constant 0 : i32
    return %c0_i32, %c0_i32_0 : i32, i32
  }
  func.func @transform_8(%arg0: i32) -> (i32, i32) {
    %c0_i32 = arith.constant 0 : i32
    %c0_i32_0 = arith.constant 0 : i32
    %c0_i32_1 = arith.constant 0 : i32
    return %c0_i32, %c0_i32_0 : i32, i32
  }
  func.func @transform_9(%arg0: i32) -> (i32, i32) {
    %c0_i32 = arith.constant 0 : i32
    %c0_i32_0 = arith.constant 0 : i32
    %c0_i32_1 = arith.constant 0 : i32
    return %c0_i32, %c0_i32_0 : i32, i32
  }
  func.func @transform_10(%arg0: i32) -> (i32, i32) {
    %c0_i32 = arith.constant 0 : i32
    %c0_i32_0 = arith.constant 0 : i32
    %c0_i32_1 = arith.constant 0 : i32
    return %c0_i32, %c0_i32_0 : i32, i32
  }
  func.func @transform_11(%arg0: i32) -> (i32, i32) {
    %c0_i32 = arith.constant 0 : i32
    %c0_i32_0 = arith.constant 0 : i32
    %c0_i32_1 = arith.constant 0 : i32
    return %c0_i32, %c0_i32_0 : i32, i32
  }
  func.func @transform_12(%arg0: i32) -> (i32, i32) {
    %c0_i32 = arith.constant 0 : i32
    %c0_i32_0 = arith.constant 0 : i32
    %c0_i32_1 = arith.constant 0 : i32
    return %c0_i32, %c0_i32_0 : i32, i32
  }
  func.func @transform_13(%arg0: i32) -> (i32, i32) {
    %c0_i32 = arith.constant 0 : i32
    %c0_i32_0 = arith.constant 0 : i32
    %c0_i32_1 = arith.constant 0 : i32
    return %c0_i32, %c0_i32_0 : i32, i32
  }
  func.func @transform_14(%arg0: i32) -> (i32, i32) {
    %c0_i32 = arith.constant 0 : i32
    %c0_i32_0 = arith.constant 0 : i32
    %c0_i32_1 = arith.constant 0 : i32
    return %c0_i32, %c0_i32_0 : i32, i32
  }
  func.func @transform_15(%arg0: i32) -> (i32, i32) {
    %c0_i32 = arith.constant 0 : i32
    %c0_i32_0 = arith.constant 0 : i32
    %c0_i32_1 = arith.constant 0 : i32
    return %c0_i32, %c0_i32_0 : i32, i32
  }
  func.func @transform_16(%arg0: i32) -> (i32, i32) {
    %c0_i32 = arith.constant 0 : i32
    %c0_i32_0 = arith.constant 0 : i32
    %c0_i32_1 = arith.constant 0 : i32
    return %c0_i32, %c0_i32_0 : i32, i32
  }
  func.func @transform_17(%arg0: i32) -> (i32, i32) {
    %c0_i32 = arith.constant 0 : i32
    %c0_i32_0 = arith.constant 0 : i32
    %c0_i32_1 = arith.constant 0 : i32
    return %c0_i32, %c0_i32_0 : i32, i32
  }
  func.func @transform_18(%arg0: i32) -> (i32, i32, i32) {
    %c0_i32 = arith.constant 0 : i32
    %c0_i32_0 = arith.constant 0 : i32
    %c0_i32_1 = arith.constant 0 : i32
    return %arg0, %c0_i32, %c0_i32_0 : i32, i32, i32
  }
}

</mosaic_0001>

<bundles_post_ra>
// kernel: hyper_atten_block.1
= control target key start
LH: loop header
LB: loop body
LE: loop exit
PB: predicated region body
PF: predicated region fallthrough
CT: control target
= control target key end

     0   :  { %s2695_s0 = inlined_call_operand.vmem [shape: f32[2,16,32], index: 0, kind: input, shape index: {}]   ;;  %s2696_s1 = inlined_call_operand.vmem [shape: bf16[2,8,16], index: 1, kind: input, shape index: {}]   ;;  %s2697_s2 = inlined_call_operand.vmem [shape: bf16[2,16,8], index: 2, kind: input, shape index: {}]   ;;  %s2698_s3 = inlined_call_operand.vmem [shape: bf16[32,32], index: 3, kind: input, shape index: {}]   ;;  %s2699_s4 = inlined_call_operand.vmem [shape: f32[32,4], index: 4, kind: input, shape index: {}]   ;;  %s2700_s5 = inlined_call_operand.vmem [shape: f32[1,4], index: 5, kind: input, shape index: {}]   ;;  %s2701_s6 = inlined_call_operand.vmem [shape: f32[2,32], index: 6, kind: input, shape index: {}]   ;;  %s2702_s7 = inlined_call_operand.vmem [shape: f32[32,2], index: 7, kind: input, shape index: {}]   ;;  %s2703_s8 = inlined_call_operand.vmem [shape: bf16[32,32], index: 8, kind: input, shape index: {}]   ;;  %s2704_s9 = inlined_call_operand.vmem [shape: f32[1,32], index: 9, kind: input, shape index: {}]   ;;  %s2705_s10 = inlined_call_operand.vmem [shape: f32[1,32], index: 10, kind: input, shape index: {}]   ;;  %s2706_s11 = inlined_call_operand.vmem [shape: f32[1,32], index: 11, kind: input, shape index: {}]   ;;  %s2707_s12 = inlined_call_operand.vmem [shape: bf16[32,32], index: 12, kind: input, shape index: {}]   ;;  %s2708_s13 = inlined_call_operand.vmem [shape: f32[1,32], index: 13, kind: input, shape index: {}]   ;;  %s2709_s14 = inlined_call_operand.vmem [shape: bf16[32,32], index: 14, kind: input, shape index: {}]   ;;  %s2710_s15 = inlined_call_operand.vmem [shape: f32[1,32], index: 15, kind: input, shape index: {}]   ;;  %s2711_s16 = inlined_call_operand.vmem [shape: f32[1,32], index: 16, kind: input, shape index: {}]   ;;  %s2712_s17 = inlined_call_operand.vmem [shape: f32[1,32], index: 17, kind: input, shape index: {}]   ;;  %s2713_s18 = inlined_call_operand.hbm [shape: f32[2,16,32], index: 18, kind: output, shape index: {}]  }
   0x1   :  { %2718 = sst [smem:[#allocation9_spill]] %s2695_s0 }
   0x2   :  { %2719 = sst [smem:[#allocation10_spill]] %s2696_s1 }
   0x3   :  { %2720 = sst [smem:[#allocation11_spill]] %s2697_s2 }
   0x4   :  { %2721 = sst [smem:[#allocation12_spill]] %s2698_s3 }
   0x5   :  { %23 = vsyncpa [#allocation3], 0 }
   0x6   :  { %25 = vsyncpa [#allocation3 + $0x1], 0  ;;  %s2360_s27 = smov 0   ;;  %s2362_s28 = smov 0  }
   0x7   :  { %s2364_s29 = smov 0   ;;  %s2366_s30 = smov 0  }
   0x8 LB: > { %2722 = sst [smem:[#allocation5_spill]] %s2249_s29  ;;  %s2381_s0 = sadd.s32 4294967295, %s2253_s30   ;;  %s2253_s30 = sphi %s2366_s30, %s2737_s30   ;;  %s2249_s29 = sphi %s2364_s29, %s2739_s29   ;;  %s2245_s28 = sphi %s2362_s28, %s2741_s28   ;;  %s2241_s27 = sphi %s2360_s27, %s2740_s27  }
   0x9   : > { %s1907_s19 = sadd.s32 4294967294, %s2253_s30   ;;  %s2385_s1 = sadd.s32 1, %s2253_s30  }
   0xa   : > { %2723 = sst [smem:[#allocation6_spill]] %s2385_s1  ;;  %s431_s20 = sadd.s32 1, %s2249_s29 }
   0xb   : > { %s428_s21 = ssub.s32 %s2253_s30, %s2385_s1  ;;  %p441_p0 = scmp.ne.s32.totalorder %s2249_s29, %s2245_s28 }
   0xc   : > { %p429_p1 = scmp.eq.s32.totalorder %s428_s21, 0  ;;  %p442_p2 = scmp.eq.s32.totalorder %s2381_s0, 1 }
   0xd   : > { %p447_p3 = scmp.ne.s32.totalorder %s2245_s28, %s2241_s27  ;;  %p448_p4 = scmp.eq.s32.totalorder %s1907_s19, 1 }
   0xe   : > { %s2396_s22 = scalar_select %p429_p1, %s2249_s29, %s431_s20  }
   0xf   : > { %p2398_p5 = por %p442_p2, %p441_p0  ;;  %p2402_p6 = por %p448_p4, %p447_p3 }
  0x10   : > { %2724 = sst [smem:[#allocation7_spill]] %s2396_s22  ;;  %p1910_p7 = scmp.ge.s32.totalorder %s2253_s30, 1 }
  0x11   : > { %s2726_s23 = scalar_select %p2402_p6, 1, 0 }
  0x12   : > { %p534_p8 = scmp.lt.s32.totalorder %s2253_s30, 3 }
  0x13   : > { %2727 = sst [smem:[#allocation8_spill]] %s2726_s23 }
  0x14   : > { %p535_p9 = pnand %p1910_p7, %p534_p8 }
  0x15   : > { %p597_p10 = scmp.lt.s32.totalorder (!%p535_p9), %s2381_s0, 1  ;;  %s2728_s1 = sld [smem:[#allocation9_spill]] (!%p535_p9) }
  0x16   : > { %538 = sbr.rel (%p535_p9) target bundleno = 3212 (0xc8c), region = 92  ;;  %s2729_s3 = sld [smem:[#allocation12_spill]] (!%p535_p9) }
  0x17   : > { %s2731_s26 = sld [smem:[#allocation11_spill]] (!%p535_p9)  ;;  %s594_s25 = sand.u32 (!%p535_p9), 1, %s2245_s28  }
  0x18   : > { %s2262_s24 = smov (!%p535_p9), [#allocation2]  }
  0x1b   : > { %v685_v0 = vld [vmem:[%s2699_s4 + $0x18] sm:$0xff]  ;;  %v684_v1 = vld [vmem:[%s2699_s4 + $0x10] sm:$0xff]  ;;  %v683_v2 = vld [vmem:[%s2699_s4 + $0x8] sm:$0xff]  ;;  %s2419_s22 = scalar_select %p597_p10, %s2381_s0, 1  ;;  %vm637_vm0 = vcmask 261120   ;;  %v2255_v6 = vmov 2  }
  0x1c   : > { %2007 = vmatprep.subr.mxu1 %v685_v0  ;;  %v682_v3 = vld [vmem:[%s2699_s4] sm:$0xff]  ;;  %2140 = vset.pattern.permute.xlu1 %v2255_v6  ;;  %v2143_v7 = vld [vmem:[%s2729_s3 + $0x8] sm:$0xff]   ;;  %v2256_v9 = vmov 0.0   ;;  %vm2257_vm1 = vmmov 0   ;;  %vm802_vm2 = vcmask 1041408   ;;  %vm780_vm5 = vcmask 15360  }
  0x1d   : > { %2008 = vmatpush3.msra.mxu1 %v685_v0  ;;  %s1959_s29 = sshll.u32 %s2419_s22, 4  ;;  %2139 = vset.pattern.permute.xlu0 %v2255_v6  ;;  %v2442_v8 = vld [vmem:[%s2701_s6] sm:$0x3]  ;;  %v2258_v20 = vmov 3   ;;  %s1914_s19 = sshll.u32 %s2419_s22, 2  ;;  %vm884_vm6 = vcmask 130048  }
  0x1e   : > { %2009 = vmatprep.subr.mxu1 %v684_v1  ;;  %s601_s23 = scalar_lea.vmem %s2728_s1, %s1959_s29  ;;  %1999 = vmatprep.subr.bf16.mxu0 %v2256_v9  ;;  %v2144_v10 = vld [vmem:[%s2729_s3] sm:$0xff]   ;;  %s2730_s29 = sld [smem:[#allocation10_spill]]  ;;  %v1047_v54 = vld [vmem:[%s2702_s7 + $0x18] sm:$0xff]  ;;  %v1046_v55 = vld [vmem:[%s2702_s7 + $0x10] sm:$0xff]  ;;  %vm1217_vm7 = vcmask 1043456   ;;  %vm1189_vm14 = vcmask 64512  }
  0x1f   : > { %2010 = vmatpush3.msra.mxu1 %v684_v1  ;;  %v2428_v4 = vld [vmem:[%s601_s23] sm:$0xff]  ;;  %v2430_v5 = vld [vmem:[%s601_s23 + $0x8] sm:$0xff]  ;;  %2003 = vmatprep.mubr.msk.bf16.mxu0 %vm2257_vm1, %v2256_v9  ;;  %s1960_s23 = sshll.u32 %s2419_s22, 3  ;;  %s2261_s22 = smov 112  }
  0x20   : > { %2011 = vmatprep.subr.mxu1 %v683_v2  ;;  %2015 = vmatprep.mubr.msk.f32.mxu1 %vm637_vm0, %v2428_v4  ;;  %v620_v11 = vpack.c.bf16 %v2430_v5, %v2428_v4  ;;  %v1920_v12 = vld [vmem:[%s2700_s5] ss:$0 sm:$0xff]  ;;  %v1045_v56 = vld [vmem:[%s2702_s7 + $0x8] sm:$0xff] }
  0x21   : > { %2012 = vmatpush3.msra.mxu1 %v683_v2  ;;  %2000 = vmatpush3.bf16.msra.mxu0 %v2143_v7  ;;  %v1044_v57 = vld [vmem:[%s2702_s7] sm:$0xff] }
  0x22   : > { %2013 = vmatprep.subr.mxu1 %v682_v3  ;;  %2001 = vmatprep.subr.bf16.mxu0 %v2256_v9 }
  0x23   : > { %2014 = vmatpush3.msra.mxu1 %v682_v3 }
  0x24   : > { %2016 = vmatmul.mubr.msk.f32.vlgmr.msra.gmra.mxu1 %vm637_vm0, %v2430_v5  ;;  %2018 = vmatprep.subr.msk.mxu1 %vm802_vm2, %v2442_v8  ;;  %s605_s1 = scalar_lea.vmem %s2730_s29, %s1914_s19  ;;  %s610_s19 = scalar_lea.vmem %s2731_s26, %s1960_s23 }
  0x25   : > { %2019 = vmatpush3.msk.msra.mxu1 %vm802_vm2, %v2442_v8  ;;  %2002 = vmatpush3.bf16.msra.mxu0 %v2144_v10  ;;  %v616_v38 = vld [vmem:[%s605_s1] sm:$0xf]  ;;  %s2259_s1 = smov 127   ;;  %v618_v10 = vld [vmem:[%s610_s19 + $0x4] sm:$0xf]  ;;  %s1911_s26 = sshll.u32 %s594_s25, 4 }
  0x26   : > { %2029 = vmatprep.subr.bf16.mxu1 %v2256_v9  ;;  %2023 = vmatprep.subr.bf16.mxu0 %v2256_v9  ;;  %vm1180_vm8 = vcmp.gt.bf16.partialorder %v618_v10, 0 }
  0x28   : > { %2004 = vmatmul.mubr.msk.bf16.vlgmr.msra.gmra.mxu0 %vm637_vm0, %v620_v11  ;;  %v617_v11 = vld [vmem:[%s610_s19] sm:$0xf]  ;;  %s1961_s19 = sshll.u32 %s2381_s0, 8  ;;  %s2655_s0 = scalar_lea.sflag [#allocation3], %s594_s25 }
  0x29   : > { %2025 = vmatprep.mubr.msk.bf16.mxu0 %vm2257_vm1, %v2256_v9  ;;  %vm1179_vm9 = vcmp.gt.bf16.partialorder %v617_v11, 0 }
  0xe4   : > { %v2017_v13 = vpop.f32.mrf.mxu1 }
  0xe5   : > { %v771_v14 = vadd.f32 %v2017_v13, %v1920_v12 }
  0xe6   : > { %v765_v15 = vpop.f32.mrf.mxu1 }
  0xe7   : > { %vm775_vm3 = vcmp.gt.f32.partialorder %v771_v14, 0.0  ;;  %v777_v16 = vmul.f32 0.2, %v771_v14  ;;  %v2465_v17 = vadd.f32 %v1920_v12, %v765_v15  ;;  %1164 = vperm.xlu1 %2140, %v771_v14   ;;  %v2260_v15 = vmov 0  }
  0xe8   : > { %v675_v39 = vpop.f32.mrf.mxu0 }
  0xe9   : > { %vm774_vm4 = vcmp.gt.f32.partialorder %v2465_v17, 0.0  ;;  %v776_v18 = vmul.f32 0.2, %v2465_v17  ;;  %v779_v19 = vsel %vm775_vm3, %v771_v14, %v777_v16  ;;  %v1182_v16 = vsel %vm1180_vm8, 65537, %v2260_v15 }
  0xea   : > { %v782_v23 = vsel %vm780_vm5, %v779_v19, -inf  ;;  %v2005_v40 = vpop.f32.mrf.mxu0 }
  0xeb   : > { %2141 = vset.pattern.permute.xlu1 %v2258_v20  ;;  %v778_v21 = vsel %vm774_vm4, %v2465_v17, %v776_v18 }
  0xec   : > { %1312 = vperm.xlu1 %2141, %v2465_v17   ;;  %v781_v22 = vsel %vm780_vm5, %v778_v21, -inf  ;;  %v678_v41 = vpop.f32.mrf.mxu0 }
  0xed   : > { %v783_v24 = vmax.f32 %v781_v22, %v782_v23 }
  0xee   : > { %v2006_v42 = vpop.f32.mrf.mxu0 }
  0xef   : > { %v784_v25 = vrot.slane %v783_v24, 4 }
  0xf0   : > { %1316 = vperm.xlu1 %2141, %v771_v14  }
  0xf1   : > { %v785_v26 = vmax.f32 %v783_v24, %v784_v25  ;;  %v2146_v25 = vld [vmem:[%s2703_s8 + $0x8] sm:$0xff]  }
  0xf3   : > { %v786_v27 = vrot.slane %v785_v26, 2 }
  0xf5   : > { %v787_v28 = vmax.f32 %v785_v26, %v786_v27 }
  0xf7   : > { %v788_v29 = vrot.slane %v787_v28, 1 }
  0xf9   : > { %v789_v30 = vmax.f32 %v787_v28, %v788_v29 }
  0xfb   : > { %v790_v31 = vsub.f32 %v778_v21, %v789_v30  ;;  %v791_v32 = vsub.f32 %v779_v19, %v789_v30  ;;  %v1184_v19 = vunpack.c.l.b16 %v1182_v16 }
  0xfd   : > { %v792_v33 = vmul.f32 1.442695, %v790_v31  ;;  %v794_v34 = vmul.f32 1.442695, %v791_v32  ;;  %vm2526_vm10 = vcmp.ne.s32.totalorder %v1184_v19, 0 }
  0xff   : > { %2151 = vpow2.f32 %v792_v33 }
 0x100   : > { %2153 = vpow2.f32 %v794_v34 }
 0x10c   : > { %v2152_v35 = vpop.eup %2151 }
 0x10d   : > { %v2154_v36 = vpop.eup %2153  ;;  %2020 = vmatprep.mubr.msk.f32.mxu1 %vm780_vm5, %v2152_v35 }
 0x10e   : > { %2021 = vmatmul.mubr.msk.f32.vlgmr.msra.gmra.mxu1 %vm780_vm5, %v2154_v36  ;;  %v928_v37 = vpack.c.bf16 %v2154_v36, %v2152_v35 }
 0x10f   : > { %2031 = vmatprep.mubr.msk.bf16.mxu1 %vm2257_vm1, %v2256_v9 }
 0x110   : > { %2030 = vmatpush3.bf16.msra.mxu1 %v928_v37 }
 0x111   : > { %2040 = vmatprep.subr.mxu1 %v2256_v9 }
 0x113   : > { %2032 = vmatmul.mubr.msk.bf16.vlgmr.msra.gmra.mxu1 %vm884_vm6, %v616_v38 }
 0x114   : > { %2048 = vmatprep.mubr.msk.f32.mxu1 %vm2257_vm1, %v2256_v9  ;;  %2041 = vmatpush3.msra.mxu1 %v1047_v54 }
 0x115   : > { %2042 = vmatprep.subr.mxu1 %v2256_v9 }
 0x116   : > { %2043 = vmatpush3.msra.mxu1 %v1046_v55 }
 0x117   : > { %2044 = vmatprep.subr.mxu1 %v2256_v9 }
 0x118   : > { %2045 = vmatpush3.msra.mxu1 %v1045_v56 }
 0x119   : > { %2046 = vmatprep.subr.mxu1 %v2256_v9 }
 0x11a   : > { %2047 = vmatpush3.msra.mxu1 %v1044_v57 }
 0x11b   : > { %2057 = vmatprep.subr.bf16.mxu1 %v2256_v9 }
 0x162   : > { %v1165_v22 = vpop.permute.xlu1 %1164 }
 0x167   : > { %v1313_v35 = vpop.permute.xlu1 %1312 }
 0x16b   : > { %v1317_v36 = vpop.permute.xlu1 %1316 }
 0x1ce   : > { %v2022_v43 = vpop.f32.mrf.mxu1 }
 0x1cf   : > { %v882_v45 = vmul.f32 %v2022_v43, %v678_v41 }
 0x1d0   : > { %v872_v44 = vpop.f32.mrf.mxu1 }
 0x1d1   : > { %v881_v46 = vmul.f32 %v872_v44, %v675_v39 }
 0x1d3   : > { %v883_v47 = vpack.c.bf16 %v882_v45, %v881_v46  ;;  %v963_v48 = vpop.f32.mrf.mxu1 }
 0x1d4   : > { %v964_v49 = vadd.f32 1e-20, %v963_v48 }
 0x1d5   : > { %v2033_v50 = vpop.f32.mrf.mxu1  ;;  %2024 = vmatpush3.bf16.msra.mxu0 %v883_v47 }
 0x1d6   : > { %2155 = vrcp.f32 %v964_v49  ;;  %2035 = vmatprep.subr.mxu0 %v2256_v9 }
 0x1d7   : > { %v966_v51 = vpop.f32.mrf.mxu1 }
 0x1d8   : > { %2026 = vmatmul.mubr.msk.bf16.vlgmr.msra.gmra.mxu0 %vm884_vm6, %v616_v38 }
 0x1d9   : > { %v2034_v52 = vpop.f32.mrf.mxu1  ;;  %2036 = vmatpush3.msk.msra.mxu0 %vm802_vm2, %v2442_v8  ;;  %2037 = vmatprep.mubr.msk.f32.mxu0 %vm2257_vm1, %v2256_v9  ;;  %v1167_v8 = vlaneseq }
 0x1da   : > { %2051 = vmatprep.subr.bf16.mxu0 %v2256_v9 }
 0x1db   : > { %v1168_v12 = vshrl.u32 %v1167_v8, 7 }
 0x1dd   : > { %v1169_v14 = vsub.s32 0, %v1168_v12 }
 0x1e3   : > { %v2156_v53 = vpop.eup %2155 }
 0x1e4   : > { %2038 = vmatmul.mubr.msk.f32.vlgmr.msra.gmra.mxu0 %vm780_vm5, %v2156_v53 }
 0x1e5   : > { %2053 = vmatprep.mubr.msk.bf16.mxu0 %vm2257_vm1, %v2256_v9 }
 0x298   : > { %v922_v58 = vpop.f32.mrf.mxu0 }
 0x29a   : > { %v2027_v59 = vpop.f32.mrf.mxu0 }
 0x29c   : > { %v925_v60 = vpop.f32.mrf.mxu0 }
 0x29e   : > { %v2028_v61 = vpop.f32.mrf.mxu0 }
 0x2a4   : > { %v1039_v62 = vpop.f32.mrf.mxu0 }
 0x2a5   : > { %v1043_v63 = vmul.f32 %v1039_v62, %v922_v58 }
 0x2a6   : > { %v2039_v0 = vpop.f32.mrf.mxu0 }
 0x2a7   : > { %v2512_v1 = vpack.c.bf16 %v1043_v63, %v1043_v63  ;;  %2049 = vmatmul.mubr.msk.f32.vlgmr.msra.gmra.mxu1 %vm637_vm0, %v1043_v63 }
 0x2a8   : > { %2059 = vmatprep.mubr.msk.bf16.mxu1 %vm2257_vm1, %v2256_v9 }
 0x2a9   : > { %v1219_v2 = vsel %vm1217_vm7, %v2512_v1, 0 }
 0x2aa   : > { %2052 = vmatpush3.bf16.msra.mxu0 %v1219_v2 }
 0x2ab   : > { %2063 = vmatprep.subr.bf16.mxu0 %v2256_v9 }
 0x367   : > { %v1117_v3 = vpop.f32.mrf.mxu1 }
 0x368   : > { %1276 = vrot.lane.b32.xlu0 %v1117_v3, %s2259_s1  ;;  %s2649_s1 = scalar_lea.hbm %s2713_s18, %s1961_s19 }
 0x369   : > { %v2050_v6 = vpop.f32.mrf.mxu1 }
 0x36c   : > { %1159 = vperm.xlu0 %2139, %v2465_v17   ;;  %v1181_v17 = vsel %vm1179_vm9, 65537, %v2260_v15 }
 0x38a   : > { %1125 = vxpose.xlu0.b32.start.end [1/1] (short) (narrow) %v1117_v3, 8 }
 0x3b3   : > { %2142 = vset.pattern.permute.xlu0 %v2258_v20  ;;  %v1183_v20 = vunpack.c.l.b16 %v1181_v17 }
 0x3b5   : > { %vm2530_vm11 = vcmp.ne.s32.totalorder %v1183_v20, 0 }
 0x3da   : > { %v1277_v7 = vpop.permute.xlu0 %1276 }
 0x3db   : > { %1279 = vxpose.xlu1.b32.start.end [1/1] (short) (narrow) %v1277_v7, 8 }
 0x3e7   : > { %v1160_v13 = vpop.permute.xlu0 %1159 }
 0x406   : > { %v1141_v18 = vpop.trf.xlu0 }
 0x407   : > { %v1170_v21 = vrot.slane %v1141_v18, %v1169_v14 }
 0x409   : > { %v1171_v23 = vadd.f32 %v1170_v21, %v1160_v13  ;;  %v1172_v24 = vadd.f32 %v1170_v21, %v1165_v22 }
 0x40b   : > { %vm1174_vm12 = vcmp.gt.f32.partialorder %v1172_v24, 0.0  ;;  %v1176_v27 = vmul.f32 0.2, %v1172_v24  ;;  %vm1173_vm13 = vcmp.gt.f32.partialorder %v1171_v23, 0.0  ;;  %v1175_v28 = vmul.f32 0.2, %v1171_v23 }
 0x40d   : > { %v1178_v29 = vsel %vm1174_vm12, %v1172_v24, %v1176_v27  ;;  %v1177_v30 = vsel %vm1173_vm13, %v1171_v23, %v1175_v28  ;;  %v2145_v24 = vld [vmem:[%s2703_s8] sm:$0xff]  }
 0x40e   : > { %v1188_v31 = vsel %vm2526_vm10, %v1178_v29, -9e+15  ;;  %v1187_v32 = vsel %vm2530_vm11, %v1177_v30, -9e+15 }
 0x40f   : > { %v1193_v33 = vsel %vm1189_vm14, %v1188_v31, -inf  ;;  %v1190_v34 = vsel %vm1189_vm14, %v1187_v32, -inf }
 0x410   : > { %1194 = vmax.xlane.f32.xlu1 %v1193_v33  ;;  %1191 = vmax.xlane.f32.xlu0 %v1190_v34 }
 0x457   : > { %v1295_v37 = vpop.trf.xlu1 }
 0x458   : > { %v1322_v38 = vrot.slane %v1295_v37, %v1169_v14 }
 0x45a   : > { %v1323_v39 = vadd.f32 %v1322_v38, %v1313_v35  ;;  %v1324_v40 = vadd.f32 %v1322_v38, %v1317_v36 }
 0x45c   : > { %vm1325_vm15 = vcmp.gt.f32.partialorder %v1323_v39, 0.0  ;;  %v1327_v41 = vmul.f32 0.2, %v1323_v39  ;;  %vm1326_vm2 = vcmp.gt.f32.partialorder %v1324_v40, 0.0  ;;  %v1328_v42 = vmul.f32 0.2, %v1324_v40 }
 0x45e   : > { %v1329_v43 = vsel %vm1325_vm15, %v1323_v39, %v1327_v41  ;;  %v1330_v44 = vsel %vm1326_vm2, %v1324_v40, %v1328_v42 }
 0x45f   : > { %v1331_v45 = vsel %vm2530_vm11, %v1329_v43, -9e+15  ;;  %v1332_v47 = vsel %vm2526_vm10, %v1330_v44, -9e+15 }
 0x460   : > { %v1333_v46 = vsel %vm1189_vm14, %v1331_v45, -inf  ;;  %v1336_v48 = vsel %vm1189_vm14, %v1332_v47, -inf }
 0x461   : > { %1334 = vmax.xlane.f32.xlu0 %v1333_v46 }
 0x465   : > { %1337 = vmax.xlane.f32.xlu0 %v1336_v48 }
 0x499   : > { %v1195_v49 = vpop.xlane.xlu1 %1194  ;;  %v1192_v50 = vpop.xlane.xlu0 %1191 }
 0x49a   : > { %v1197_v51 = vsub.f32 %v1188_v31, %v1195_v49  ;;  %v1196_v52 = vsub.f32 %v1187_v32, %v1192_v50 }
 0x49c   : > { %v1200_v53 = vmul.f32 1.442695, %v1197_v51  ;;  %v1198_v54 = vmul.f32 1.442695, %v1196_v52 }
 0x49e   : > { %2157 = vpow2.f32 %v1200_v53 }
 0x49f   : > { %2159 = vpow2.f32 %v1198_v54 }
 0x4ab   : > { %v2158_v55 = vpop.eup %2157 }
 0x4ac   : > { %v2160_v56 = vpop.eup %2159  ;;  %v1205_v57 = vsel %vm1189_vm14, %v2158_v55, 0.0 }
 0x4ad   : > { %1206 = vadd.xlane.f32.xlu0 %v1205_v57  ;;  %v1202_v58 = vsel %vm1189_vm14, %v2160_v56, 0.0 }
 0x4ae   : > { %1203 = vadd.xlane.f32.xlu1 %v1202_v58 }
 0x4ea   : > { %v1335_v59 = vpop.xlane.xlu0 %1334 }
 0x4eb   : > { %v1339_v60 = vsub.f32 %v1331_v45, %v1335_v59 }
 0x4ed   : > { %v1341_v61 = vmul.f32 1.442695, %v1339_v60 }
 0x4ee   : > { %v1338_v62 = vpop.xlane.xlu0 %1337 }
 0x4ef   : > { %2161 = vpow2.f32 %v1341_v61  ;;  %v1340_v63 = vsub.f32 %v1332_v47, %v1338_v62  ;;  %v1941_v61 = vld [vmem:[%s2704_s9] ss:$0 sm:$0xff] }
 0x4f1   : > { %v1343_v0 = vmul.f32 1.442695, %v1340_v63 }
 0x4f3   : > { %2163 = vpow2.f32 %v1343_v0 }
 0x4fc   : > { %v2162_v2 = vpop.eup %2161 }
 0x4fd   : > { %v1345_v3 = vsel %vm1189_vm14, %v2162_v2, 0.0 }
 0x4fe   : > { %1346 = vadd.xlane.f32.xlu1 %v1345_v3 }
 0x500   : > { %v2164_v6 = vpop.eup %2163 }
 0x501   : > { %v1348_v7 = vsel %vm1189_vm14, %v2164_v6, 0.0 }
 0x502   : > { %1349 = vadd.xlane.f32.xlu0 %v1348_v7 }
 0x50f   : > { %1357 = vrot.lane.b32.xlu1 %v2512_v1, %s2261_s22  ;;  %s596_s22 = scalar_lea.vmem [#allocation2], %s1911_s26  ;;  %s2197_s26 = sshll.u32 %s2262_s24, 4  ;;  %s2198_s26 = int_to_ptr.vmem [resolvable:$false] %s2197_s26 }
 0x510   : > { %s1821_s20 = sshll.u32 %s596_s22, 4  ;;  %s2199_s19 = scalar_lea.vmem %s2198_s26, 512  ;;  %s2651_s20 = int_to_ptr.vmem [resolvable:$true] %s1821_s20 }
 0x511   : > { %s2193_s23 = scalar_lea.vmem %s2651_s20, 256  ;;  %p2200_p0 = scmp.lt.s32.totalorder %s2651_s20, %s2198_s26 }
 0x512   : > { %p2194_p11 = scmp.ne.s32.totalorder %s2651_s20, %s2193_s23  ;;  %p2201_p1 = scmp.lt.s32.totalorder %s2199_s19, %s2193_s23 }
 0x514   : > { %p2195_p12 = pnand %p2194_p11, %p2398_p5  ;;  %p2202_p2 = por %p2201_p1, %p2200_p0 }
 0x516   : > { %p2196_p13 = pneg %p2195_p12 }
 0x518   : > { %p2203_p3 = pnand %p2202_p2, %p2196_p13 }
 0x536   : > { %v1207_v8 = vpop.xlane.xlu0 %1206 }
 0x537   : > { %v1204_v10 = vpop.xlane.xlu1 %1203  ;;  %2165 = vrcp.f32 %v1207_v8 }
 0x538   : > { %2167 = vrcp.f32 %v1204_v10 }
 0x544   : > { %v2166_v11 = vpop.eup %2165 }
 0x545   : > { %v2168_v12 = vpop.eup %2167  ;;  %v1211_v13 = vmul.f32 %v2166_v11, %v2158_v55 }
 0x546   : > { %v1210_v14 = vmul.f32 %v2168_v12, %v2160_v56 }
 0x548   : > { %v1212_v15 = vpack.c.bf16 %v1211_v13, %v1210_v14 }
 0x54a   : > { %2054 = vmatmul.mubr.msk.bf16.vlgmr.msra.gmra.mxu0 %vm1189_vm14, %v1212_v15 }
 0x54b   : > { %2065 = vmatprep.mubr.msk.bf16.mxu0 %vm2257_vm1, %v2256_v9  ;;  %2064 = vmatpush3.bf16.msra.mxu0 %v2146_v25  ;;  %v2148_v25 = vld [vmem:[%s2707_s12] sm:$0xff]  }
 0x54c   : > { %2075 = vmatprep.subr.bf16.mxu0 %v2256_v9 }
 0x587   : > { %v1347_v16 = vpop.xlane.xlu1 %1346 }
 0x588   : > { %2169 = vrcp.f32 %v1347_v16 }
 0x58b   : > { %v1358_v17 = vpop.permute.xlu1 %1357  ;;  %v1350_v18 = vpop.xlane.xlu0 %1349 }
 0x58c   : > { %v1363_v1 = vsel %vm1217_vm7, %v1358_v17, 0  ;;  %2171 = vrcp.f32 %v1350_v18 }
 0x58d   : > { %2058 = vmatpush3.bf16.msra.mxu1 %v1363_v1 }
 0x58e   : > { %2069 = vmatprep.subr.bf16.mxu1 %v2256_v9 }
 0x595   : > { %v2170_v19 = vpop.eup %2169 }
 0x596   : > { %v1353_v21 = vmul.f32 %v2170_v19, %v2162_v2 }
 0x599   : > { %v2172_v20 = vpop.eup %2171 }
 0x59a   : > { %v1354_v22 = vmul.f32 %v2172_v20, %v2164_v6 }
 0x59c   : > { %v1355_v23 = vpack.c.bf16 %v1354_v22, %v1353_v21 }
 0x59e   : > { %2060 = vmatmul.mubr.msk.bf16.vlgmr.msra.gmra.mxu1 %vm1189_vm14, %v1355_v23 }
 0x59f   : > { %2071 = vmatprep.mubr.msk.bf16.mxu1 %vm2257_vm1, %v2256_v9  ;;  %2070 = vmatpush3.bf16.msra.mxu1 %v2145_v24 }
 0x5a0   : > { %2083 = vmatprep.subr.bf16.mxu1 %v2256_v9 }
 0x60a   : > { %v1255_v26 = vpop.f32.mrf.mxu0 }
 0x60b   : > { %v1264_v27 = vmin.f32 %v1255_v26, 0.0  ;;  %vm1262_vm3 = vcmp.gt.f32.partialorder %v1255_v26, 0.0 }
 0x60c   : > { %v2055_v28 = vpop.f32.mrf.mxu0 }
 0x60d   : > { %v1266_v29 = vmul.f32 1.442695, %v1264_v27 }
 0x60e   : > { %v1258_v30 = vpop.f32.mrf.mxu0 }
 0x60f   : > { %2173 = vpow2.f32 %v1266_v29  ;;  %v1265_v31 = vmin.f32 %v1258_v30, 0.0  ;;  %vm1263_vm4 = vcmp.gt.f32.partialorder %v1258_v30, 0.0 }
 0x610   : > { %v2056_v32 = vpop.f32.mrf.mxu0 }
 0x611   : > { %v1268_v33 = vmul.f32 1.442695, %v1265_v31 }
 0x613   : > { %2175 = vpow2.f32 %v1268_v33 }
 0x61c   : > { %v2174_v34 = vpop.eup %2173 }
 0x61d   : > { %v1932_v35 = vadd.f32 -1.0, %v2174_v34  ;;  %v2592_v34 = vld [vmem:[%s2705_s10] ss:$0 sm:$0xff] }
 0x61f   : > { %v1272_v38 = vsel %vm1262_vm3, %v1255_v26, %v1932_v35 }
 0x620   : > { %v2176_v36 = vpop.eup %2175 }
 0x621   : > { %v1933_v37 = vadd.f32 -1.0, %v2176_v36 }
 0x623   : > { %v1273_v39 = vsel %vm1263_vm4, %v1258_v30, %v1933_v37 }
 0x624   : > { %v1274_v40 = vpack.c.bf16 %v1273_v39, %v1272_v38  ;;  %v2598_v38 = vld [vmem:[%s2706_s11] ss:$0 sm:$0xff] }
 0x626   : > { %2072 = vmatmul.mubr.msk.bf16.vlgmr.msra.gmra.mxu1 %vm884_vm6, %v1274_v40 }
 0x627   : > { %2087 = vmatprep.mubr.msk.bf16.mxu1 %vm2257_vm1, %v2256_v9 }
 0x65e   : > { %v1399_v41 = vpop.f32.mrf.mxu1 }
 0x65f   : > { %v1408_v42 = vmin.f32 %v1399_v41, 0.0  ;;  %vm1406_vm5 = vcmp.gt.f32.partialorder %v1399_v41, 0.0 }
 0x660   : > { %v2061_v43 = vpop.f32.mrf.mxu1 }
 0x661   : > { %v1410_v44 = vmul.f32 1.442695, %v1408_v42  ;;  %v2149_v43 = vld [vmem:[%s2709_s14 + $0x8] sm:$0xff]  }
 0x662   : > { %v1402_v45 = vpop.f32.mrf.mxu1  ;;  %2084 = vmatpush3.bf16.msra.mxu1 %v2149_v43 }
 0x663   : > { %2177 = vpow2.f32 %v1410_v44  ;;  %v1409_v46 = vmin.f32 %v1402_v45, 0.0  ;;  %vm1407_vm7 = vcmp.gt.f32.partialorder %v1402_v45, 0.0  ;;  %2085 = vmatprep.subr.bf16.mxu1 %v2256_v9  ;;  %v2150_v44 = vld [vmem:[%s2709_s14] sm:$0xff]  }
 0x664   : > { %v2062_v47 = vpop.f32.mrf.mxu1 }
 0x665   : > { %v1412_v48 = vmul.f32 1.442695, %v1409_v46 }
 0x666   : > { %2086 = vmatpush3.bf16.msra.mxu1 %v2150_v44 }
 0x667   : > { %2179 = vpow2.f32 %v1412_v48 }
 0x670   : > { %v2178_v49 = vpop.eup %2177 }
 0x671   : > { %v1935_v50 = vadd.f32 -1.0, %v2178_v49 }
 0x673   : > { %v1416_v53 = vsel %vm1406_vm5, %v1399_v41, %v1935_v50 }
 0x674   : > { %v2180_v51 = vpop.eup %2179 }
 0x675   : > { %v1936_v52 = vadd.f32 -1.0, %v2180_v51 }
 0x677   : > { %v1417_v54 = vsel %vm1407_vm7, %v1402_v45, %v1936_v52  ;;  %v1944_v45 = vld [vmem:[%s2708_s13] ss:$0 sm:$0xff] }
 0x678   : > { %v1418_v55 = vpack.c.bf16 %v1417_v54, %v1416_v53 }
 0x67a   : > { %2066 = vmatmul.mubr.msk.bf16.vlgmr.msra.gmra.mxu0 %vm884_vm6, %v1418_v55 }
 0x67b   : > { %2079 = vmatprep.mubr.msk.bf16.mxu0 %vm2257_vm1, %v2256_v9 }
 0x6e6   : > { %v1512_v56 = vpop.f32.mrf.mxu1 }
 0x6e8   : > { %v2073_v57 = vpop.f32.mrf.mxu1 }
 0x6ea   : > { %v1515_v58 = vpop.f32.mrf.mxu1 }
 0x6ec   : > { %v2074_v59 = vpop.f32.mrf.mxu1 }
 0x73a   : > { %v1462_v60 = vpop.f32.mrf.mxu0 }
 0x73b   : > { %v1513_v62 = vadd.f32 %v1512_v56, %v1462_v60  ;;  %v1948_v56 = vld [vmem:[%s2710_s15] ss:$0 sm:$0xff] }
 0x73c   : > { %v2067_v63 = vpop.f32.mrf.mxu0 }
 0x73d   : > { %v1528_v0 = vadd.f32 %v1941_v61, %v1513_v62 }
 0x73e   : > { %v1465_v2 = vpop.f32.mrf.mxu0 }
 0x73f   : > { %v1532_v3 = vmul.f32 0.01, %v1528_v0  ;;  %v1516_v6 = vadd.f32 %v1515_v58, %v1465_v2  ;;  %vm1530_vm8 = vcmp.gt.f32.partialorder %v1528_v0, 0.0 }
 0x740   : > { %v2068_v7 = vpop.f32.mrf.mxu0 }
 0x741   : > { %v1529_v8 = vadd.f32 %v1941_v61, %v1516_v6  ;;  %v1534_v10 = vsel %vm1530_vm8, %v1528_v0, %v1532_v3 }
 0x742   : > { %v1536_v11 = vadd.f32 %v1534_v10, %v2428_v4 }
 0x743   : > { %v1533_v12 = vmul.f32 0.01, %v1529_v8  ;;  %vm1531_vm1 = vcmp.gt.f32.partialorder %v1529_v8, 0.0 }
 0x744   : > { %v1538_v13 = vsel %vm637_vm0, %v1536_v11, 0.0 }
 0x745   : > { %1539 = vadd.xlane.f32.xlu0 %v1538_v13  ;;  %v1535_v14 = vsel %vm1531_vm1, %v1529_v8, %v1533_v12 }
 0x746   : > { %v1537_v15 = vadd.f32 %v1535_v14, %v2430_v5  ;;  %v2147_v5 = vld [vmem:[%s2707_s12 + $0x8] sm:$0xff]  }
 0x747   : > { %2076 = vmatpush3.bf16.msra.mxu0 %v2147_v5 }
 0x748   : > { %v1541_v16 = vsel %vm637_vm0, %v1537_v15, 0.0  ;;  %2077 = vmatprep.subr.bf16.mxu0 %v2256_v9 }
 0x749   : > { %1542 = vadd.xlane.f32.xlu0 %v1541_v16 }
 0x74b   : > { %2078 = vmatpush3.bf16.msra.mxu0 %v2148_v25  ;;  %v1953_v25 = vld [vmem:[%s2712_s17] ss:$0 sm:$0xff] }
 0x7ce   : > { %v1540_v17 = vpop.xlane.xlu0 %1539 }
 0x7cf   : > { %v1545_v18 = vmul.f32 0.03125, %v1540_v17 }
 0x7d1   : > { %v1547_v1 = vsub.f32 %v1536_v11, %v1545_v18 }
 0x7d2   : > { %v1543_v19 = vpop.xlane.xlu0 %1542 }
 0x7d3   : > { %v1546_v20 = vmul.f32 0.03125, %v1543_v19  ;;  %v1549_v21 = vmul.f32 %v1547_v1, %v1547_v1 }
 0x7d5   : > { %v1548_v22 = vsub.f32 %v1537_v15, %v1546_v20  ;;  %v1551_v4 = vsel %vm637_vm0, %v1549_v21, 0.0 }
 0x7d6   : > { %1552 = vadd.xlane.f32.xlu0 %v1551_v4 }
 0x7d7   : > { %v1550_v23 = vmul.f32 %v1548_v22, %v1548_v22 }
 0x7d9   : > { %v1554_v24 = vsel %vm637_vm0, %v1550_v23, 0.0 }
 0x7da   : > { %1555 = vadd.xlane.f32.xlu0 %v1554_v24  ;;  %v1952_v24 = vld [vmem:[%s2711_s16] ss:$0 sm:$0xff] }
 0x85f   : > { %v1553_v26 = vpop.xlane.xlu0 %1552 }
 0x860   : > { %v1557_v27 = vmul.f32 0.03125, %v1553_v26 }
 0x862   : > { %v1559_v28 = vadd.f32 1e-05, %v1557_v27 }
 0x863   : > { %v1556_v29 = vpop.xlane.xlu0 %1555 }
 0x864   : > { %2181 = vrsqrt.f32 %v1559_v28  ;;  %v1558_v30 = vmul.f32 0.03125, %v1556_v29 }
 0x866   : > { %v1560_v31 = vadd.f32 1e-05, %v1558_v30 }
 0x868   : > { %2183 = vrsqrt.f32 %v1560_v31 }
 0x871   : > { %v2182_v32 = vpop.eup %2181 }
 0x872   : > { %v1563_v33 = vmul.f32 %v2182_v32, %v1547_v1 }
 0x874   : > { %v1571_v37 = vmul.f32 %v2592_v34, %v1563_v33 }
 0x875   : > { %v2184_v35 = vpop.eup %2183 }
 0x876   : > { %v1564_v36 = vmul.f32 %v2184_v35, %v1548_v22  ;;  %v2602_v40 = vadd.f32 %v2598_v38, %v1571_v37 }
 0x878   : > { %v1572_v39 = vmul.f32 %v2592_v34, %v1564_v36 }
 0x87a   : > { %v2605_v41 = vadd.f32 %v2598_v38, %v1572_v39 }
 0x87c   : > { %v1581_v42 = vpack.c.bf16 %v2605_v41, %v2602_v40 }
 0x87e   : > { %2080 = vmatmul.mubr.msk.bf16.vlgmr.msra.gmra.mxu0 %vm637_vm0, %v1581_v42 }
 0x93e   : > { %v1642_v46 = vpop.f32.mrf.mxu0 }
 0x93f   : > { %v1643_v47 = vadd.f32 %v1944_v45, %v1642_v46 }
 0x940   : > { %v2081_v48 = vpop.f32.mrf.mxu0 }
 0x941   : > { %v1651_v50 = vmul.f32 0.01, %v1643_v47  ;;  %vm1649_vm6 = vcmp.gt.f32.partialorder %v1643_v47, 0.0 }
 0x942   : > { %v1645_v49 = vpop.f32.mrf.mxu0 }
 0x943   : > { %v1646_v51 = vadd.f32 %v1944_v45, %v1645_v49  ;;  %v1653_v9 = vsel %vm1649_vm6, %v1643_v47, %v1651_v50 }
 0x944   : > { %v2082_v52 = vpop.f32.mrf.mxu0 }
 0x945   : > { %vm1650_vm9 = vcmp.gt.f32.partialorder %v1646_v51, 0.0  ;;  %v1652_v53 = vmul.f32 0.01, %v1646_v51 }
 0x947   : > { %v1654_v54 = vsel %vm1650_vm9, %v1646_v51, %v1652_v53 }
 0x948   : > { %v1655_v55 = vpack.c.bf16 %v1654_v54, %v1653_v9 }
 0x94a   : > { %2088 = vmatmul.mubr.msk.bf16.vlgmr.msra.gmra.mxu1 %vm637_vm0, %v1655_v55 }
 0xa0a   : > { %v1716_v57 = vpop.f32.mrf.mxu1 }
 0xa0b   : > { %v1717_v58 = vadd.f32 %v1948_v56, %v1716_v57 }
 0xa0c   : > { %v2089_v59 = vpop.f32.mrf.mxu1 }
 0xa0d   : > { %v1725_v60 = vmul.f32 0.01, %v1717_v58  ;;  %vm1723_vm10 = vcmp.gt.f32.partialorder %v1717_v58, 0.0 }
 0xa0e   : > { %v1719_v61 = vpop.f32.mrf.mxu1 }
 0xa0f   : > { %v1720_v62 = vadd.f32 %v1948_v56, %v1719_v61  ;;  %v1727_v63 = vsel %vm1723_vm10, %v1717_v58, %v1725_v60 }
 0xa10   : > { %v2090_v0 = vpop.f32.mrf.mxu1  ;;  %v1731_v2 = vsel %vm637_vm0, %v1727_v63, 0.0 }
 0xa11   : > { %v1726_v3 = vmul.f32 0.01, %v1720_v62  ;;  %1732 = vadd.xlane.f32.xlu1 %v1731_v2  ;;  %vm1724_vm11 = vcmp.gt.f32.partialorder %v1720_v62, 0.0 }
 0xa13   : > { %v1728_v6 = vsel %vm1724_vm11, %v1720_v62, %v1726_v3 }
 0xa14   : > { %v1734_v7 = vsel %vm637_vm0, %v1728_v6, 0.0 }
 0xa15   : > { %1735 = vadd.xlane.f32.xlu0 %v1734_v7 }
 0xa9a   : > { %v1733_v8 = vpop.xlane.xlu1 %1732 }
 0xa9b   : > { %v1737_v10 = vmul.f32 0.03125, %v1733_v8 }
 0xa9d   : > { %v1739_v11 = vsub.f32 %v1727_v63, %v1737_v10 }
 0xa9e   : > { %v1736_v12 = vpop.xlane.xlu0 %1735 }
 0xa9f   : > { %v1738_v13 = vmul.f32 0.03125, %v1736_v12  ;;  %v1741_v14 = vmul.f32 %v1739_v11, %v1739_v11 }
 0xaa1   : > { %v1740_v15 = vsub.f32 %v1728_v6, %v1738_v13  ;;  %v1743_v16 = vsel %vm637_vm0, %v1741_v14, 0.0 }
 0xaa2   : > { %1744 = vadd.xlane.f32.xlu0 %v1743_v16 }
 0xaa3   : > { %v1742_v17 = vmul.f32 %v1740_v15, %v1740_v15 }
 0xaa5   : > { %v1746_v18 = vsel %vm637_vm0, %v1742_v17, 0.0 }
 0xaa6   : > { %1747 = vadd.xlane.f32.xlu0 %v1746_v18 }
 0xb2b   : > { %v1745_v1 = vpop.xlane.xlu0 %1744 }
 0xb2c   : > { %v1749_v19 = vmul.f32 0.03125, %v1745_v1 }
 0xb2e   : > { %v1751_v20 = vadd.f32 1e-05, %v1749_v19 }
 0xb2f   : > { %v1748_v21 = vpop.xlane.xlu0 %1747 }
 0xb30   : > { %2185 = vrsqrt.f32 %v1751_v20  ;;  %v1750_v22 = vmul.f32 0.03125, %v1748_v21 }
 0xb32   : > { %v1752_v4 = vadd.f32 1e-05, %v1750_v22 }
 0xb34   : > { %2187 = vrsqrt.f32 %v1752_v4 }
 0xb3d   : > { %v2186_v23 = vpop.eup %2185 }
 0xb3e   : > { %v1755_v5 = vmul.f32 %v2186_v23, %v1739_v11 }
 0xb40   : > { %v1763_v26 = vmul.f32 %v1952_v24, %v1755_v5 }
 0xb41   : > { %v2188_v27 = vpop.eup %2187 }
 0xb42   : > { %v1771_v28 = vadd.f32 %v1953_v25, %v1763_v26  ;;  %v1756_v29 = vmul.f32 %v2188_v27, %v1740_v15 }
 0xb44   : > { %v1773_v30 = vadd.f32 %v1771_v28, %v2602_v40  ;;  %v1764_v31 = vmul.f32 %v1952_v24, %v1756_v29 }
 0xb46   : > { %v1775_v32 = vsel %vm637_vm0, %v1773_v30, 0.0  ;;  %v1772_v33 = vadd.f32 %v1953_v25, %v1764_v31 }
 0xb47   : > { %1776 = vadd.xlane.f32.xlu0 %v1775_v32 }
 0xb48   : > { %v1774_v35 = vadd.f32 %v1772_v33, %v2605_v41 }
 0xb4a   : > { %v1778_v36 = vsel %vm637_vm0, %v1774_v35, 0.0 }
 0xb4b   : > { %1779 = vadd.xlane.f32.xlu0 %v1778_v36 }
 0xbd0   : > { %v1777_v37 = vpop.xlane.xlu0 %1776 }
 0xbd1   : > { %v1781_v39 = vmul.f32 0.03125, %v1777_v37 }
 0xbd3   : > { %v1783_v42 = vsub.f32 %v1773_v30, %v1781_v39 }
 0xbd4   : > { %v1780_v43 = vpop.xlane.xlu0 %1779 }
 0xbd5   : > { %v1782_v44 = vmul.f32 0.03125, %v1780_v43  ;;  %v1785_v45 = vmul.f32 %v1783_v42, %v1783_v42 }
 0xbd7   : > { %v1784_v46 = vsub.f32 %v1774_v35, %v1782_v44  ;;  %v1787_v40 = vsel %vm637_vm0, %v1785_v45, 0.0 }
 0xbd8   : > { %1788 = vadd.xlane.f32.xlu0 %v1787_v40 }
 0xbd9   : > { %v1786_v47 = vmul.f32 %v1784_v46, %v1784_v46 }
 0xbdb   : > { %v1790_v48 = vsel %vm637_vm0, %v1786_v47, 0.0 }
 0xbdc   : > { %1791 = vadd.xlane.f32.xlu0 %v1790_v48 }
 0xc61   : > { %v1789_v49 = vpop.xlane.xlu0 %1788 }
 0xc62   : > { %v1793_v41 = vmul.f32 0.03125, %v1789_v49 }
 0xc64   : > { %v1795_v50 = vadd.f32 1e-05, %v1793_v41 }
 0xc65   : > { %v1792_v51 = vpop.xlane.xlu0 %1791 }
 0xc66   : > { %2189 = vrsqrt.f32 %v1795_v50  ;;  %v1794_v52 = vmul.f32 0.03125, %v1792_v51 }
 0xc68   : > { %v1796_v53 = vadd.f32 1e-05, %v1794_v52 }
 0xc6a   : > { %2191 = vrsqrt.f32 %v1796_v53 }
 0xc73   : > { %v2190_v9 = vpop.eup %2189 }
 0xc74   : > { %v1799_v54 = vmul.f32 %v2190_v9, %v1783_v42 }
 0xc76   : > { %v1801_v55 = vmul.f32 %v2592_v34, %v1799_v54 }
 0xc77   : > { %v2192_v56 = vpop.eup %2191 }
 0xc78   : > { %v1800_v57 = vmul.f32 %v2192_v56, %v1784_v46  ;;  %v1803_v58 = vadd.f32 %v2598_v38, %v1801_v55 }
 0xc7a   : > { %v1802_v59 = vmul.f32 %v2592_v34, %v1800_v57  ;;  %1805 = vst.msk [vmem:[%s596_s22] sm:$0xff] %vm637_vm0, %v1803_v58 }
 0xc7c   : > { %v1804_v60 = vadd.f32 %v2598_v38, %v1802_v59 }
 0xc7e   : > { %1806 = vst.msk [vmem:[%s596_s22 + $0x8] sm:$0xff] %vm637_vm0, %v1804_v60 }
 0xc7f   : > { %2206 = shalt.err (!%p2203_p3)
}
 0xc80   : > { %s2207_s25 = scalar_lea.hbm %s2649_s1, 256  ;;  %s2211_s29 = scalar_lea.hbm %s2713_s18, 512 }
 0xc81   : > { %p2208_p4 = scmp.ne.s32.totalorder %s2649_s1, %s2207_s25  ;;  %p2212_p9 = scmp.lt.s32.totalorder %s2649_s1, %s2713_s18 }
 0xc82   : > { %p2213_p10 = scmp.lt.s32.totalorder %s2211_s29, %s2207_s25 }
 0xc83   : > { %p2209_p7 = pnand %p2208_p4, %p2398_p5 }
 0xc84   : > { %p2214_p11 = por %p2213_p10, %p2212_p9 }
 0xc85   : > { %p2210_p8 = pneg %p2209_p7 }
 0xc87   : > { %p2215_p12 = pnand %p2214_p11, %p2210_p8 }
 0xc89   : > { %2218 = shalt.err (!%p2215_p12)
}
 0xc8a   : > { %s2263_s23 = smov 128   ;;  %s2264_s26 = smov 8  }
 0xc8b   : > { %2091 = dma.vmem_to_hbm [thread:$0]  (%p2398_p5), %s2651_s20, 256, %s2649_s1, %s2655_s0, %s2263_s23, %s2263_s23, %s2264_s26  }
 0xc8c PF: > { %p2097_p13 = scmp.ge.s32.totalorder %s2253_s30, 2  ;;  %s1836_s22 = sand.u32 1, %s2241_s27  }
 0xc8d   : > { %s1837_s3 = scalar_lea.sflag [#allocation3], %s1836_s22 }
 0xc8e   : > { %p2094_p0 = pnand %p2097_p13, %p2402_p6 }
 0xc90   : > { %p2095_p1 = pneg %p2094_p0 }
 0xc92   : > { %2236 = dma.done.wait (%p2095_p1), %s1837_s3, 256  }
 0xc93   : > { %2238 = vsyncadd (%p2095_p1), %s1837_s3, 4294967040  ;;  %s2737_s30 = sld [smem:[#allocation6_spill]]  ;;  %s2740_s27 = smov %s2245_s28 }
 0xc94   : > { %s2738_s25 = sld [smem:[#allocation5_spill]] }
 0xc95   : > { %s2739_s29 = sld [smem:[#allocation7_spill]] }
 0xc99   : > { %p28_p2 = scmp.ge.s32.totalorder %s2737_s30, 4  }
 0xc9a   : > { %s2741_s28 = smov %s2738_s25 }
 0xc9b   :  { %30 = sbr.rel (!%p28_p2) target bundleno = 8 (0x8), region = 133 }
 0xca0   :  { %1842 = vsyncpa [#allocation3], 1 }
 0xca1   :  { %1844 = vsyncpa [#allocation3 + $0x1], 1 }

</bundles_post_ra>
